<compile_context>
chip_gen: v7x
topology: tpu7x:2x2x1
jax: 0.10.0
libtpu: 0.0.40
codegen_flags: <defaults>
</compile_context>

<pallas_src>
import functools

import jax
import jax.numpy as jnp
from jax import lax
from jax.experimental import pallas as pl
from jax.experimental.pallas import tpu as pltpu

LEAKY_SLOPE = 0.2
GN_EPS = 1e-5
NUM_GROUPS = 4


def _vmem_capacity_bytes():
    """Best-effort per-core VMEM capacity; conservative (v7x) fallback."""
    try:
        info = pltpu.get_tpu_info()
        cap = getattr(info, "vmem_capacity_bytes", None)
        if cap:
            return int(cap)
    except Exception:
        pass
    return 64 * 1024 * 1024


def _dcgan_upconv_kernel(x_ref, w_ref, b_ref, g_ref, be_ref, mask_ref,
                         mg_ref, me_ref, e_ref, out_ref, rhs_ref, *,
                         offs, Fp, inv_count):
    """One grid step: nb samples of fused-tap conv + GroupNorm + LeakyReLU."""
    nb, cin, _ = x_ref.shape
    R = out_ref.shape[1]

    # --- batched im2col: all taps x all samples into ONE scratch operand.
    #     Lane offsets n*Fp are 128-aligned -> lane-dense scratch stores. ---
    for n in range(nb):
        xn = x_ref[n]                                        # (Cin, L)
        for t, off in enumerate(offs):
            rhs_ref[t * cin:(t + 1) * cin, n * Fp:(n + 1) * Fp] = \
                xn[:, off:off + Fp]

    # --- a single MXU contraction for the whole batch block ---
    y = jnp.dot(w_ref[...], rhs_ref[...],
                preferred_element_type=jnp.float32) + b_ref[...]   # (R, nb*Fp) f32

    # --- GroupNorm(4) statistics ---
    # masked per-row, per-sample lane sums (wrap-around / pad columns excluded)
    mask = mask_ref[...]                                     # (1, nb*Fp)
    ym = y * mask
    y2m = ym * y
    cols = []
    for n in range(nb):                                      # sum(x)
        cols.append(jnp.sum(ym[:, n * Fp:(n + 1) * Fp], axis=1, keepdims=True))
    for n in range(nb):                                      # sum(x^2)
        cols.append(jnp.sum(y2m[:, n * Fp:(n + 1) * Fp], axis=1, keepdims=True))
    t12 = jnp.concatenate(cols, axis=1)                      # (R, 2*nb)

    # fold rows -> groups with a tiny membership matmul (no sub-tile reshapes)
    s = jnp.dot(mg_ref[...], t12, preferred_element_type=jnp.float32)   # (G, 2*nb)
    mean_g = s[:, :nb] * inv_count                           # (G, nb)
    var_g = s[:, nb:] * inv_count - mean_g * mean_g
    inv_g = lax.rsqrt(var_g + GN_EPS)                        # (G, nb)

    # expand groups -> rows with a tiny membership matmul
    stats = jnp.dot(me_ref[...], jnp.concatenate([mean_g, inv_g], axis=1),
                    preferred_element_type=jnp.float32)      # (R, 2*nb)
    mean_r = stats[:, :nb]
    inv_r = stats[:, nb:]
    a = inv_r * g_ref[...]                                   # (R, nb) scale
    bsh = be_ref[...] - mean_r * a                           # (R, nb) shift

    # --- affine + LeakyReLU(0.2), applied to the whole batch block at once ---
    if nb == 1:
        z = y * a + bsh                                      # (R,1) lane-broadcast
    else:
        e = e_ref[...]                                       # (nb, nb*Fp) one-hot
        z = y * jnp.dot(a, e, preferred_element_type=jnp.float32) \
            + jnp.dot(bsh, e, preferred_element_type=jnp.float32)
    z = jnp.where(z >= 0, z, LEAKY_SLOPE * z)

    # lane-aligned, lane-dense per-sample stores
    for n in range(nb):
        out_ref[n] = z[:, n * Fp:(n + 1) * Fp]


def dcgan_upconv_forward(x_nchw, params, *, stride,
                         compute_dtype=jnp.bfloat16, max_nb=8):
    """Equivalent of dcgan_upconv(nin, nout, stride).forward(x), x in NCHW."""
    w_t, b = params["weight"], params["bias"]          # (Cin, Cout, 3, 3), (Cout,)
    gamma, beta = params["gamma"], params["beta"]      # (Cout,), (Cout,)
    Cin, Cout, K, _ = w_t.shape
    assert K == 3 and Cout % NUM_GROUPS == 0
    N, _, H, Win = x_nchw.shape

    x = x_nchw.astype(jnp.float32)
    w32 = w_t.astype(jnp.float32)

    if stride == 2:
        # Sub-pixel decomposition: out[2a+py, 2b+px] uses only the 2x2
        # neighbourhood {x[a..a+1, b..b+1]} with a fixed weight per parity.
        npar = 4
        Wp = Win + 1                                    # right zero-pad 1
        taps = ((0, 0), (0, 1), (1, 0), (1, 1))

        def wk(kh, kw):                                 # (Cout, Cin)
            return w32[:, :, kh, kw].T

        zz = jnp.zeros((Cout, Cin), jnp.float32)
        blocks = [
            [wk(1, 1), zz,        zz,        zz       ],   # parity (0,0)
            [wk(1, 2), wk(1, 0),  zz,        zz       ],   # parity (0,1)
            [wk(2, 1), zz,        wk(0, 1),  zz       ],   # parity (1,0)
            [wk(2, 2), wk(2, 0),  wk(0, 2),  wk(0, 0)],    # parity (1,1)
        ]
        wmat = jnp.concatenate(
            [jnp.concatenate(r, axis=1) for r in blocks], axis=0)  # (4Cout, 4Cin)
        xpad = jnp.pad(x, ((0, 0), (0, 0), (0, 1), (0, 1)))        # bottom/right 1
    elif stride == 1:
        # stride=1, pad=1, op=0 transposed conv == ordinary 3x3 same-conv with
        # the spatially flipped, channel-swapped kernel.
        npar = 1
        Wp = Win + 2                                    # left/right zero-pad 1
        taps = tuple((dy, dx) for dy in range(3) for dx in range(3))
        wflip = jnp.flip(w32, axis=(2, 3))                          # (Cin,Cout,3,3)
        wmat = wflip.transpose(2, 3, 0, 1).reshape(9 * Cin, Cout).T  # (Cout, 9Cin)
        xpad = jnp.pad(x, ((0, 0), (0, 0), (1, 1), (1, 1)))
    else:
        raise ValueError("stride must be 1 or 2")

    T = len(taps)
    R = npar * Cout
    F = H * Wp                                          # real flattened width
    Fp = ((F + 127) // 128) * 128                       # lane-dense padded width
    offs = tuple(dy * Wp + dx for dy, dx in taps)
    L = max(offs) + Fp                                  # flat input length needed

    xflat = xpad.reshape(N, Cin, -1)
    xflat = jnp.pad(xflat, ((0, 0), (0, 0), (0, L - xflat.shape[-1])))
    xflat = xflat.astype(compute_dtype)
    wmat = wmat.astype(compute_dtype)

    bias_r = jnp.tile(b.astype(jnp.float32), npar).reshape(R, 1)
    gamma_r = jnp.tile(gamma.astype(jnp.float32), npar).reshape(R, 1)
    beta_r = jnp.tile(beta.astype(jnp.float32), npar).reshape(R, 1)

    col = jnp.arange(Fp)
    colmask = ((col < F) & ((col % Wp) < Win)).astype(jnp.float32)   # (Fp,)

    gs = Cout // NUM_GROUPS
    grp = (jnp.arange(R) % Cout) // gs                               # (R,)
    me = (grp[:, None] == jnp.arange(NUM_GROUPS)[None, :]).astype(jnp.float32)
    mg = me.T                                                        # (G, R)

    # --- batch-block size nb: VMEM-budget-aware and megacore-aware ---
    csize = jnp.dtype(compute_dtype).itemsize
    vmem_cap = _vmem_capacity_bytes()
    budget = int(vmem_cap * 0.6)

    def step_bytes(nbv):
        return (2 * nbv * Cin * L * csize            # double-buffered input block
                + 2 * nbv * R * Fp * 4               # double-buffered output block
                + T * Cin * nbv * Fp * csize         # im2col scratch
                + 4 * R * nbv * Fp * 4               # y / masked / scale / z headroom
                + 2 * (R * T * Cin * csize + 3 * R * 4 + nbv * Fp * 4
                       + nbv * nbv * Fp * 4 + 2 * R * NUM_GROUPS * 4))

    nb = 1
    for d in range(1, min(N, max_nb) + 1):
        if N % d != 0:
            continue
        if N >= 4 and d > N // 2:       # keep >= 2 grid steps for 2-TC (v7x) chips
            continue
        if step_bytes(d) <= budget:
            nb = d

    maskf = jnp.tile(colmask, nb).reshape(1, nb * Fp)
    emat = jnp.repeat(jnp.eye(nb, dtype=jnp.float32), Fp, axis=1)    # (nb, nb*Fp)

    count = float(gs * npar * H * Win)               # elements per (sample, group)
    kernel = functools.partial(_dcgan_upconv_kernel, offs=offs, Fp=Fp,
                               inv_count=1.0 / count)

    vmem_limit = int(min(vmem_cap * 3 // 4, 100 * 1024 * 1024))
    flops = 2 * N * R * (T * Cin) * Fp + 12 * N * R * Fp
    bytes_accessed = (N * Cin * L * csize + N * R * Fp * 4
                      + (N // nb) * (R * T * Cin * csize + 3 * R * 4
                                     + nb * Fp * 4 + nb * nb * Fp * 4
                                     + 2 * R * NUM_GROUPS * 4))

    out_k = pl.pallas_call(
        kernel,
        out_shape=jax.ShapeDtypeStruct((N, R, Fp), jnp.float32),
        grid_spec=pltpu.PrefetchScalarGridSpec(
            num_scalar_prefetch=0,
            grid=(N // nb,),
            in_specs=[
                pl.BlockSpec((nb, Cin, L), lambda i: (i, 0, 0)),
                pl.BlockSpec((R, T * Cin), lambda i: (0, 0)),
                pl.BlockSpec((R, 1), lambda i: (0, 0)),
                pl.BlockSpec((R, 1), lambda i: (0, 0)),
                pl.BlockSpec((R, 1), lambda i: (0, 0)),
                pl.BlockSpec((1, nb * Fp), lambda i: (0, 0)),
                pl.BlockSpec((NUM_GROUPS, R), lambda i: (0, 0)),
                pl.BlockSpec((R, NUM_GROUPS), lambda i: (0, 0)),
                pl.BlockSpec((nb, nb * Fp), lambda i: (0, 0)),
            ],
            out_specs=pl.BlockSpec((nb, R, Fp), lambda i: (i, 0, 0)),
            scratch_shapes=[pltpu.VMEM((T * Cin, nb * Fp), compute_dtype)],
        ),
        compiler_params=pltpu.CompilerParams(
            dimension_semantics=("parallel",),
            vmem_limit_bytes=vmem_limit),
        cost_estimate=pl.CostEstimate(flops=flops,
                                      transcendentals=N * NUM_GROUPS,
                                      bytes_accessed=bytes_accessed),
    )(xflat, wmat, bias_r, gamma_r, beta_r, maskf, mg, me, emat)

    out_k = out_k[:, :, :F]
    if stride == 2:
        # pixel-shuffle the 4 parity planes and drop the wrap-around columns
        y = out_k.reshape(N, 2, 2, Cout, H, Wp)[..., :Win]
        y = y.transpose(0, 3, 4, 1, 5, 2).reshape(N, Cout, 2 * H, 2 * Win)
    else:
        y = out_k.reshape(N, Cout, H, Wp)[..., :Win]
    return y


def _reference(x_nchw, params, *, stride):
    """Pure-JAX (XLA) reference matching the PyTorch module."""
    w_t, b = params["weight"], params["bias"]
    gamma, beta = params["gamma"], params["beta"]
    Cin, Cout, K, _ = w_t.shape
    pad = 1
    op = 1 if stride == 2 else 0
    w_flip = jnp.flip(w_t, axis=(2, 3)).transpose(1, 0, 2, 3)        # OIHW
    conv = lax.conv_general_dilated(
        x_nchw.astype(jnp.float32), w_flip.astype(jnp.float32),
        window_strides=(1, 1),
        padding=((K - 1 - pad, K - 1 - pad + op), (K - 1 - pad, K - 1 - pad + op)),
        lhs_dilation=(stride, stride),
        dimension_numbers=("NCHW", "OIHW", "NCHW"))
    conv = conv + b[None, :, None, None]
    N, C, Hh, Ww = conv.shape
    g = NUM_GROUPS
    xg = conv.reshape(N, g, C // g, Hh, Ww)
    mean = xg.mean(axis=(2, 3, 4), keepdims=True)
    var = ((xg - mean) ** 2).mean(axis=(2, 3, 4), keepdims=True)
    xn = ((xg - mean) / jnp.sqrt(var + GN_EPS)).reshape(N, C, Hh, Ww)
    xn = xn * gamma[None, :, None, None] + beta[None, :, None, None]
    return jnp.where(xn >= 0, xn, LEAKY_SLOPE * xn)


if __name__ == "__main__":
    key = jax.random.PRNGKey(0)
    k1, k2, k3, k4, k5 = jax.random.split(key, 5)

    # small shapes consistent with the module: nin=4, nout=8 (divisible by 4 groups)
    N, Cin, H, Wsp = 2, 4, 16, 16
    Cout, K = 8, 3

    x = jax.random.normal(k1, (N, Cin, H, Wsp), dtype=jnp.float32)
    params = dict(
        weight=0.1 * jax.random.normal(k2, (Cin, Cout, K, K), dtype=jnp.float32),
        bias=0.1 * jax.random.normal(k3, (Cout,), dtype=jnp.float32),
        gamma=1.0 + 0.1 * jax.random.normal(k4, (Cout,), dtype=jnp.float32),
        beta=0.1 * jax.random.normal(k5, (Cout,), dtype=jnp.float32),
    )

    # 1) stride = 2 (PhyDNet decoder upsampling), f32 MXU operands, batched grid step
    ref2 = _reference(x, params, stride=2)
    out2 = jax.block_until_ready(
        dcgan_upconv_forward(x, params, stride=2, compute_dtype=jnp.float32))
    assert out2.shape == (N, Cout, 2 * H, 2 * Wsp), out2.shape
    assert jnp.allclose(out2, ref2, atol=1e-4, rtol=1e-4), \
        float(jnp.max(jnp.abs(out2 - ref2)))

    # 2) stride = 1 configuration, f32 MXU operands
    ref1 = _reference(x, params, stride=1)
    out1 = jax.block_until_ready(
        dcgan_upconv_forward(x, params, stride=1, compute_dtype=jnp.float32))
    assert out1.shape == (N, Cout, H, Wsp), out1.shape
    assert jnp.allclose(out1, ref1, atol=1e-4, rtol=1e-4), \
        float(jnp.max(jnp.abs(out1 - ref1)))

    # 3) stride = 2 with nb=1 (one sample per grid step / megacore-style grid), f32
    out2s = jax.block_until_ready(
        dcgan_upconv_forward(x, params, stride=2, compute_dtype=jnp.float32,
                             max_nb=1))
    assert jnp.allclose(out2s, ref2, atol=1e-4, rtol=1e-4), \
        float(jnp.max(jnp.abs(out2s - ref2)))

    # 4) stride = 2 with bf16 MXU operands (default fast path, f32 accumulation)
    out2b = jax.block_until_ready(dcgan_upconv_forward(x, params, stride=2))
    assert jnp.allclose(out2b, ref2, atol=1e-1, rtol=1e-1), \
        float(jnp.max(jnp.abs(out2b - ref2)))

    print("KERNEL_OK")
</pallas_src>

<mosaic_0001>
module attributes {stable_mosaic.version = 11 : i64} {
  func.func @_dcgan_upconv_kernel(%arg0: i32, %arg1: memref<2x4x402xf32, #tpu.memory_space<vmem>>, %arg2: memref<32x16xf32, #tpu.memory_space<vmem>>, %arg3: memref<32x1xf32, #tpu.memory_space<vmem>>, %arg4: memref<32x1xf32, #tpu.memory_space<vmem>>, %arg5: memref<32x1xf32, #tpu.memory_space<vmem>>, %arg6: memref<1x768xf32, #tpu.memory_space<vmem>>, %arg7: memref<4x32xf32, #tpu.memory_space<vmem>>, %arg8: memref<32x4xf32, #tpu.memory_space<vmem>>, %arg9: memref<2x768xf32, #tpu.memory_space<vmem>>, %arg10: memref<2x32x384xf32, #tpu.memory_space<vmem>>, %arg11: memref<16x768xf32, #tpu.memory_space<vmem>>) attributes {dimension_semantics = [#tpu.dimension_semantics<parallel>], iteration_bounds = array<i64: 1>, scalar_prefetch = 0 : i64, scratch_operands = 1 : i64, tpu.core_type = #tpu.core_type<tc>, window_params = [{transform_indices = @transform_0, window_bounds = array<i64: 2, 4, 402>}, {pipeline_mode = #tpu.pipeline_mode<synchronous>, transform_indices = @transform_1, window_bounds = array<i64: 32, 16>}, {pipeline_mode = #tpu.pipeline_mode<synchronous>, transform_indices = @transform_2, window_bounds = array<i64: 32, 1>}, {pipeline_mode = #tpu.pipeline_mode<synchronous>, transform_indices = @transform_3, window_bounds = array<i64: 32, 1>}, {pipeline_mode = #tpu.pipeline_mode<synchronous>, transform_indices = @transform_4, window_bounds = array<i64: 32, 1>}, {pipeline_mode = #tpu.pipeline_mode<synchronous>, transform_indices = @transform_5, window_bounds = array<i64: 1, 768>}, {pipeline_mode = #tpu.pipeline_mode<synchronous>, transform_indices = @transform_6, window_bounds = array<i64: 4, 32>}, {pipeline_mode = #tpu.pipeline_mode<synchronous>, transform_indices = @transform_7, window_bounds = array<i64: 32, 4>}, {pipeline_mode = #tpu.pipeline_mode<synchronous>, transform_indices = @transform_8, window_bounds = array<i64: 2, 768>}, {transform_indices = @transform_9, window_bounds = array<i64: 2, 32, 384>}]} {
    %c0 = arith.constant 0 : index
    %c0_0 = arith.constant 0 : index
    %c0_1 = arith.constant 0 : index
    %0 = vector.load %arg1[%c0, %c0_0, %c0_1] : memref<2x4x402xf32, #tpu.memory_space<vmem>>, vector<1x4x402xf32>
    %1 = vector.shape_cast %0 : vector<1x4x402xf32> to vector<4x402xf32>
    %2 = vector.extract_strided_slice %1 {offsets = [0, 0], sizes = [4, 384], strides = [1, 1]} : vector<4x402xf32> to vector<4x384xf32>
    %c0_2 = arith.constant 0 : index
    %c0_3 = arith.constant 0 : index
    %3 = vector.load %arg11[%c0_2, %c0_3] : memref<16x768xf32, #tpu.memory_space<vmem>>, vector<4x384xf32>
    tpu.vector_store %arg11[%c0_2, %c0_3], %2 {strides = array<i32>} : memref<16x768xf32, #tpu.memory_space<vmem>>, vector<4x384xf32>,
    %4 = vector.extract_strided_slice %1 {offsets = [0, 1], sizes = [4, 384], strides = [1, 1]} : vector<4x402xf32> to vector<4x384xf32>
    %c4 = arith.constant 4 : index
    %c0_4 = arith.constant 0 : index
    %5 = vector.load %arg11[%c4, %c0_4] : memref<16x768xf32, #tpu.memory_space<vmem>>, vector<4x384xf32>
    tpu.vector_store %arg11[%c4, %c0_4], %4 {strides = array<i32>} : memref<16x768xf32, #tpu.memory_space<vmem>>, vector<4x384xf32>,
    %6 = vector.extract_strided_slice %1 {offsets = [0, 17], sizes = [4, 384], strides = [1, 1]} : vector<4x402xf32> to vector<4x384xf32>
    %c8 = arith.constant 8 : index
    %c0_5 = arith.constant 0 : index
    %7 = vector.load %arg11[%c8, %c0_5] : memref<16x768xf32, #tpu.memory_space<vmem>>, vector<4x384xf32>
    tpu.vector_store %arg11[%c8, %c0_5], %6 {strides = array<i32>} : memref<16x768xf32, #tpu.memory_space<vmem>>, vector<4x384xf32>,
    %8 = vector.extract_strided_slice %1 {offsets = [0, 18], sizes = [4, 384], strides = [1, 1]} : vector<4x402xf32> to vector<4x384xf32>
    %c12 = arith.constant 12 : index
    %c0_6 = arith.constant 0 : index
    %9 = vector.load %arg11[%c12, %c0_6] : memref<16x768xf32, #tpu.memory_space<vmem>>, vector<4x384xf32>
    tpu.vector_store %arg11[%c12, %c0_6], %8 {strides = array<i32>} : memref<16x768xf32, #tpu.memory_space<vmem>>, vector<4x384xf32>,
    %c1 = arith.constant 1 : index
    %c0_7 = arith.constant 0 : index
    %c0_8 = arith.constant 0 : index
    %10 = vector.load %arg1[%c1, %c0_7, %c0_8] : memref<2x4x402xf32, #tpu.memory_space<vmem>>, vector<1x4x402xf32>
    %11 = vector.shape_cast %10 : vector<1x4x402xf32> to vector<4x402xf32>
    %12 = vector.extract_strided_slice %11 {offsets = [0, 0], sizes = [4, 384], strides = [1, 1]} : vector<4x402xf32> to vector<4x384xf32>
    %c0_9 = arith.constant 0 : index
    %c384 = arith.constant 384 : index
    %13 = vector.load %arg11[%c0_9, %c384] : memref<16x768xf32, #tpu.memory_space<vmem>>, vector<4x384xf32>
    tpu.vector_store %arg11[%c0_9, %c384], %12 {strides = array<i32>} : memref<16x768xf32, #tpu.memory_space<vmem>>, vector<4x384xf32>,
    %14 = vector.extract_strided_slice %11 {offsets = [0, 1], sizes = [4, 384], strides = [1, 1]} : vector<4x402xf32> to vector<4x384xf32>
    %c4_10 = arith.constant 4 : index
    %c384_11 = arith.constant 384 : index
    %15 = vector.load %arg11[%c4_10, %c384_11] : memref<16x768xf32, #tpu.memory_space<vmem>>, vector<4x384xf32>
    tpu.vector_store %arg11[%c4_10, %c384_11], %14 {strides = array<i32>} : memref<16x768xf32, #tpu.memory_space<vmem>>, vector<4x384xf32>,
    %16 = vector.extract_strided_slice %11 {offsets = [0, 17], sizes = [4, 384], strides = [1, 1]} : vector<4x402xf32> to vector<4x384xf32>
    %c8_12 = arith.constant 8 : index
    %c384_13 = arith.constant 384 : index
    %17 = vector.load %arg11[%c8_12, %c384_13] : memref<16x768xf32, #tpu.memory_space<vmem>>, vector<4x384xf32>
    tpu.vector_store %arg11[%c8_12, %c384_13], %16 {strides = array<i32>} : memref<16x768xf32, #tpu.memory_space<vmem>>, vector<4x384xf32>,
    %18 = vector.extract_strided_slice %11 {offsets = [0, 18], sizes = [4, 384], strides = [1, 1]} : vector<4x402xf32> to vector<4x384xf32>
    %c12_14 = arith.constant 12 : index
    %c384_15 = arith.constant 384 : index
    %19 = vector.load %arg11[%c12_14, %c384_15] : memref<16x768xf32, #tpu.memory_space<vmem>>, vector<4x384xf32>
    tpu.vector_store %arg11[%c12_14, %c384_15], %18 {strides = array<i32>} : memref<16x768xf32, #tpu.memory_space<vmem>>, vector<4x384xf32>,
    %c0_16 = arith.constant 0 : index
    %c0_17 = arith.constant 0 : index
    %20 = vector.load %arg2[%c0_16, %c0_17] : memref<32x16xf32, #tpu.memory_space<vmem>>, vector<32x16xf32>
    %c0_18 = arith.constant 0 : index
    %c0_19 = arith.constant 0 : index
    %21 = vector.load %arg11[%c0_18, %c0_19] : memref<16x768xf32, #tpu.memory_space<vmem>>, vector<16x768xf32>
    %cst = arith.constant dense<0.000000e+00> : vector<32x768xf32>
    %22 = tpu.matmul %20, %21, %cst {dimension_numbers = #tpu.dot_dimension_numbers<[1], [0], [0], [1], [0, 0, 1, 1], [], []>} : vector<32x16xf32>, vector<16x768xf32>, vector<32x768xf32> -> vector<32x768xf32>
    %c0_20 = arith.constant 0 : index
    %c0_21 = arith.constant 0 : index
    %23 = vector.load %arg3[%c0_20, %c0_21] : memref<32x1xf32, #tpu.memory_space<vmem>>, vector<32x1xf32>
    %24 = vector.broadcast %23 : vector<32x1xf32> to vector<32x768xf32>
    %25 = arith.addf %22, %24 : vector<32x768xf32>
    %c0_22 = arith.constant 0 : index
    %c0_23 = arith.constant 0 : index
    %26 = vector.load %arg6[%c0_22, %c0_23] : memref<1x768xf32, #tpu.memory_space<vmem>>, vector<1x768xf32>
    %27 = vector.broadcast %26 : vector<1x768xf32> to vector<32x768xf32>
    %28 = arith.mulf %25, %27 : vector<32x768xf32>
    %29 = arith.mulf %28, %25 : vector<32x768xf32>
    %30 = vector.extract_strided_slice %28 {offsets = [0, 0], sizes = [32, 384], strides = [1, 1]} : vector<32x768xf32> to vector<32x384xf32>
    %cst_24 = arith.constant dense<0.000000e+00> : vector<32xf32>
    %31 = vector.multi_reduction <add>, %30, %cst_24 [1] : vector<32x384xf32> to vector<32xf32>
    %32 = vector.shape_cast %31 : vector<32xf32> to vector<32x1xf32>
    %33 = vector.extract_strided_slice %28 {offsets = [0, 384], sizes = [32, 384], strides = [1, 1]} : vector<32x768xf32> to vector<32x384xf32>
    %cst_25 = arith.constant dense<0.000000e+00> : vector<32xf32>
    %34 = vector.multi_reduction <add>, %33, %cst_25 [1] : vector<32x384xf32> to vector<32xf32>
    %35 = vector.shape_cast %34 : vector<32xf32> to vector<32x1xf32>
    %36 = vector.extract_strided_slice %29 {offsets = [0, 0], sizes = [32, 384], strides = [1, 1]} : vector<32x768xf32> to vector<32x384xf32>
    %cst_26 = arith.constant dense<0.000000e+00> : vector<32xf32>
    %37 = vector.multi_reduction <add>, %36, %cst_26 [1] : vector<32x384xf32> to vector<32xf32>
    %38 = vector.shape_cast %37 : vector<32xf32> to vector<32x1xf32>
    %39 = vector.extract_strided_slice %29 {offsets = [0, 384], sizes = [32, 384], strides = [1, 1]} : vector<32x768xf32> to vector<32x384xf32>
    %cst_27 = arith.constant dense<0.000000e+00> : vector<32xf32>
    %40 = vector.multi_reduction <add>, %39, %cst_27 [1] : vector<32x384xf32> to vector<32xf32>
    %41 = vector.shape_cast %40 : vector<32xf32> to vector<32x1xf32>
    %42 = tpu.concatenate %32, %35, %38, %41 in 1 : vector<32x1xf32>, vector<32x1xf32>, vector<32x1xf32>, vector<32x1xf32> -> vector<32x4xf32>
    %c0_28 = arith.constant 0 : index
    %c0_29 = arith.constant 0 : index
    %43 = vector.load %arg7[%c0_28, %c0_29] : memref<4x32xf32, #tpu.memory_space<vmem>>, vector<4x32xf32>
    %cst_30 = arith.constant dense<0.000000e+00> : vector<4x4xf32>
    %44 = tpu.matmul %43, %42, %cst_30 {dimension_numbers = #tpu.dot_dimension_numbers<[1], [0], [0], [1], [0, 0, 1, 1], [], []>} : vector<4x32xf32>, vector<32x4xf32>, vector<4x4xf32> -> vector<4x4xf32>
    %45 = vector.extract_strided_slice %44 {offsets = [0, 0], sizes = [4, 2], strides = [1, 1]} : vector<4x4xf32> to vector<4x2xf32>
    %cst_31 = arith.constant 4.8828125E-4 : f32
    %46 = vector.broadcast %cst_31 : f32 to vector<4x2xf32>
    %47 = arith.mulf %45, %46 : vector<4x2xf32>
    %48 = vector.extract_strided_slice %44 {offsets = [0, 2], sizes = [4, 2], strides = [1, 1]} : vector<4x4xf32> to vector<4x2xf32>
    %cst_32 = arith.constant 4.8828125E-4 : f32
    %49 = vector.broadcast %cst_32 : f32 to vector<4x2xf32>
    %50 = arith.mulf %48, %49 : vector<4x2xf32>
    %51 = arith.mulf %47, %47 : vector<4x2xf32>
    %52 = arith.subf %50, %51 : vector<4x2xf32>
    %cst_33 = arith.constant 9.99999974E-6 : f32
    %53 = vector.broadcast %cst_33 : f32 to vector<4x2xf32>
    %54 = arith.addf %52, %53 : vector<4x2xf32>
    %55 = math.rsqrt %54 : vector<4x2xf32>
    %c0_34 = arith.constant 0 : index
    %c0_35 = arith.constant 0 : index
    %56 = vector.load %arg8[%c0_34, %c0_35] : memref<32x4xf32, #tpu.memory_space<vmem>>, vector<32x4xf32>
    %57 = tpu.concatenate %47, %55 in 1 : vector<4x2xf32>, vector<4x2xf32> -> vector<4x4xf32>
    %cst_36 = arith.constant dense<0.000000e+00> : vector<32x4xf32>
    %58 = tpu.matmul %56, %57, %cst_36 {dimension_numbers = #tpu.dot_dimension_numbers<[1], [0], [0], [1], [0, 0, 1, 1], [], []>} : vector<32x4xf32>, vector<4x4xf32>, vector<32x4xf32> -> vector<32x4xf32>
    %59 = vector.extract_strided_slice %58 {offsets = [0, 0], sizes = [32, 2], strides = [1, 1]} : vector<32x4xf32> to vector<32x2xf32>
    %60 = vector.extract_strided_slice %58 {offsets = [0, 2], sizes = [32, 2], strides = [1, 1]} : vector<32x4xf32> to vector<32x2xf32>
    %c0_37 = arith.constant 0 : index
    %c0_38 = arith.constant 0 : index
    %61 = vector.load %arg4[%c0_37, %c0_38] : memref<32x1xf32, #tpu.memory_space<vmem>>, vector<32x1xf32>
    %62 = vector.broadcast %61 : vector<32x1xf32> to vector<32x2xf32>
    %63 = arith.mulf %60, %62 : vector<32x2xf32>
    %c0_39 = arith.constant 0 : index
    %c0_40 = arith.constant 0 : index
    %64 = vector.load %arg5[%c0_39, %c0_40] : memref<32x1xf32, #tpu.memory_space<vmem>>, vector<32x1xf32>
    %65 = arith.mulf %59, %63 : vector<32x2xf32>
    %66 = vector.broadcast %64 : vector<32x1xf32> to vector<32x2xf32>
    %67 = arith.subf %66, %65 : vector<32x2xf32>
    %c0_41 = arith.constant 0 : index
    %c0_42 = arith.constant 0 : index
    %68 = vector.load %arg9[%c0_41, %c0_42] : memref<2x768xf32, #tpu.memory_space<vmem>>, vector<2x768xf32>
    %cst_43 = arith.constant dense<0.000000e+00> : vector<32x768xf32>
    %69 = tpu.matmul %63, %68, %cst_43 {dimension_numbers = #tpu.dot_dimension_numbers<[1], [0], [0], [1], [0, 0, 1, 1], [], []>} : vector<32x2xf32>, vector<2x768xf32>, vector<32x768xf32> -> vector<32x768xf32>
    %70 = arith.mulf %25, %69 : vector<32x768xf32>
    %cst_44 = arith.constant dense<0.000000e+00> : vector<32x768xf32>
    %71 = tpu.matmul %67, %68, %cst_44 {dimension_numbers = #tpu.dot_dimension_numbers<[1], [0], [0], [1], [0, 0, 1, 1], [], []>} : vector<32x2xf32>, vector<2x768xf32>, vector<32x768xf32> -> vector<32x768xf32>
    %72 = arith.addf %70, %71 : vector<32x768xf32>
    %cst_45 = arith.constant 0.000000e+00 : f32
    %73 = vector.broadcast %cst_45 : f32 to vector<32x768xf32>
    %74 = arith.cmpf oge, %72, %73 : vector<32x768xf32>
    %cst_46 = arith.constant 2.000000e-01 : f32
    %75 = vector.broadcast %cst_46 : f32 to vector<32x768xf32>
    %76 = arith.mulf %75, %72 : vector<32x768xf32>
    %77 = arith.select %74, %72, %76 : vector<32x768xi1>, vector<32x768xf32>
    %78 = vector.extract_strided_slice %77 {offsets = [0, 0], sizes = [32, 384], strides = [1, 1]} : vector<32x768xf32> to vector<32x384xf32>
    %c0_47 = arith.constant 0 : index
    %c0_48 = arith.constant 0 : index
    %c0_49 = arith.constant 0 : index
    %79 = vector.load %arg10[%c0_47, %c0_48, %c0_49] : memref<2x32x384xf32, #tpu.memory_space<vmem>>, vector<1x32x384xf32>
    %80 = vector.shape_cast %79 : vector<1x32x384xf32> to vector<32x384xf32>
    %81 = vector.shape_cast %78 : vector<32x384xf32> to vector<1x32x384xf32>
    tpu.vector_store %arg10[%c0_47, %c0_48, %c0_49], %81 {strides = array<i32>} : memref<2x32x384xf32, #tpu.memory_space<vmem>>, vector<1x32x384xf32>,
    %82 = vector.extract_strided_slice %77 {offsets = [0, 384], sizes = [32, 384], strides = [1, 1]} : vector<32x768xf32> to vector<32x384xf32>
    %c1_50 = arith.constant 1 : index
    %c0_51 = arith.constant 0 : index
    %c0_52 = arith.constant 0 : index
    %83 = vector.load %arg10[%c1_50, %c0_51, %c0_52] : memref<2x32x384xf32, #tpu.memory_space<vmem>>, vector<1x32x384xf32>
    %84 = vector.shape_cast %83 : vector<1x32x384xf32> to vector<32x384xf32>
    %85 = vector.shape_cast %82 : vector<32x384xf32> to vector<1x32x384xf32>
    tpu.vector_store %arg10[%c1_50, %c0_51, %c0_52], %85 {strides = array<i32>} : memref<2x32x384xf32, #tpu.memory_space<vmem>>, vector<1x32x384xf32>,
    return
  }
  func.func @transform_0(%arg0: i32) -> (i32, i32, i32) {
    %c0_i32 = arith.constant 0 : i32
    %c0_i32_0 = arith.constant 0 : i32
    %c0_i32_1 = arith.constant 0 : i32
    return %arg0, %c0_i32, %c0_i32_0 : i32, i32, i32
  }
  func.func @transform_1(%arg0: i32) -> (i32, i32) {
    %c0_i32 = arith.constant 0 : i32
    %c0_i32_0 = arith.constant 0 : i32
    %c0_i32_1 = arith.constant 0 : i32
    return %c0_i32, %c0_i32_0 : i32, i32
  }
  func.func @transform_2(%arg0: i32) -> (i32, i32) {
    %c0_i32 = arith.constant 0 : i32
    %c0_i32_0 = arith.constant 0 : i32
    %c0_i32_1 = arith.constant 0 : i32
    return %c0_i32, %c0_i32_0 : i32, i32
  }
  func.func @transform_3(%arg0: i32) -> (i32, i32) {
    %c0_i32 = arith.constant 0 : i32
    %c0_i32_0 = arith.constant 0 : i32
    %c0_i32_1 = arith.constant 0 : i32
    return %c0_i32, %c0_i32_0 : i32, i32
  }
  func.func @transform_4(%arg0: i32) -> (i32, i32) {
    %c0_i32 = arith.constant 0 : i32
    %c0_i32_0 = arith.constant 0 : i32
    %c0_i32_1 = arith.constant 0 : i32
    return %c0_i32, %c0_i32_0 : i32, i32
  }
  func.func @transform_5(%arg0: i32) -> (i32, i32) {
    %c0_i32 = arith.constant 0 : i32
    %c0_i32_0 = arith.constant 0 : i32
    %c0_i32_1 = arith.constant 0 : i32
    return %c0_i32, %c0_i32_0 : i32, i32
  }
  func.func @transform_6(%arg0: i32) -> (i32, i32) {
    %c0_i32 = arith.constant 0 : i32
    %c0_i32_0 = arith.constant 0 : i32
    %c0_i32_1 = arith.constant 0 : i32
    return %c0_i32, %c0_i32_0 : i32, i32
  }
  func.func @transform_7(%arg0: i32) -> (i32, i32) {
    %c0_i32 = arith.constant 0 : i32
    %c0_i32_0 = arith.constant 0 : i32
    %c0_i32_1 = arith.constant 0 : i32
    return %c0_i32, %c0_i32_0 : i32, i32
  }
  func.func @transform_8(%arg0: i32) -> (i32, i32) {
    %c0_i32 = arith.constant 0 : i32
    %c0_i32_0 = arith.constant 0 : i32
    %c0_i32_1 = arith.constant 0 : i32
    return %c0_i32, %c0_i32_0 : i32, i32
  }
  func.func @transform_9(%arg0: i32) -> (i32, i32, i32) {
    %c0_i32 = arith.constant 0 : i32
    %c0_i32_0 = arith.constant 0 : i32
    %c0_i32_1 = arith.constant 0 : i32
    return %arg0, %c0_i32, %c0_i32_0 : i32, i32, i32
  }
}

</mosaic_0001>

<bundles_post_ra>
// kernel: tpu_custom_call.1
= control target key start
LH: loop header
LB: loop body
LE: loop exit
PB: predicated region body
PF: predicated region fallthrough
CT: control target
= control target key end

     0   :  { %s1820_s15 = smov 127   ;;  %s2359_s0 = inlined_call_operand.vmem [shape: f32[2,4,402], index: 0, kind: input, shape index: {}]   ;;  %s2360_s1 = inlined_call_operand.vmem [shape: f32[32,16], index: 1, kind: input, shape index: {}]   ;;  %s2361_s2 = inlined_call_operand.vmem [shape: f32[32,1], index: 2, kind: input, shape index: {}]   ;;  %s2362_s3 = inlined_call_operand.vmem [shape: f32[32,1], index: 3, kind: input, shape index: {}]   ;;  %s2363_s4 = inlined_call_operand.vmem [shape: f32[32,1], index: 4, kind: input, shape index: {}]   ;;  %s2364_s5 = inlined_call_operand.vmem [shape: f32[1,768], index: 5, kind: input, shape index: {}]   ;;  %s2365_s6 = inlined_call_operand.vmem [shape: f32[4,32], index: 6, kind: input, shape index: {}]   ;;  %s2366_s7 = inlined_call_operand.vmem [shape: f32[32,4], index: 7, kind: input, shape index: {}]   ;;  %s2367_s8 = inlined_call_operand.vmem [shape: f32[2,768], index: 8, kind: input, shape index: {}]   ;;  %s2368_s9 = inlined_call_operand.hbm [shape: f32[2,32,384], index: 9, kind: output, shape index: {}]  }
   0x1   :  { %v33_v0 = vld [vmem:[%s2359_s0] sm:$0xff]  ;;  %v34_v1 = vld [vmem:[%s2359_s0 + $0x8] sm:$0xff]  ;;  %v1666_v2 = vld [vmem:[%s2359_s0 + $0x10] sm:$0xff] }
   0x2   :  { %46 = vrot.lane.b32.xlu0 %v33_v0, %s1820_s15  ;;  %39 = vst [vmem:[#allocation2] sm:$0xf] %v33_v0  ;;  %v37_v3 = vcombine.high %v33_v0, %v33_v0  ;;  %41 = vst [vmem:[#allocation2 + $0x10] sm:$0xf] %v34_v1  ;;  %v43_v4 = vcombine.low %v34_v1, %v34_v1  ;;  %v1667_v5 = vld [vmem:[%s2359_s0 + $0x18] sm:$0xff] }
   0x3   :  { %106 = vst [vmem:[#allocation2 + $0x18] sm:$0xf] %v1666_v2 }
   0x4   :  { %14 = vsyncpa [#allocation4], 0  ;;  %v104_v6 = vcombine.high %v1666_v2, %v1666_v2  ;;  %108 = vst [vmem:[#allocation2 + $0x28] sm:$0xf] %v1667_v5  ;;  %s1821_s18 = smov 111   ;;  %s1822_s19 = smov 110   ;;  %v42_v7 = vcombine.low %v33_v0, %v33_v0  ;;  %v109_v8 = vcombine.low %v1666_v2, %v1666_v2  ;;  %v62_v10 = vcombine.high %v34_v1, %v34_v1 }
   0x5   :  { %65 = vrot.lane.b32.xlu1 %v37_v3, %s1821_s18  ;;  %40 = vst [vmem:[#allocation2 + $0x8] sm:$0xf] %v37_v3  ;;  %v1823_v9 = vmov 0.0   ;;  %v110_v11 = vcombine.low %v1667_v5, %v1667_v5  ;;  %v128_v12 = vcombine.high %v1667_v5, %v1667_v5  ;;  %v179_v13 = vld [vmem:[%s2361_s2] sm:$0xff]  ;;  %v180_v14 = vld [vmem:[%s2361_s2 + $0x8] sm:$0xff]  ;;  %v1824_v15 = vmov 0  }
   0x6   :  { %107 = vst [vmem:[#allocation2 + $0x20] sm:$0xf] %v104_v6  ;;  %48 = vrot.lane.b32.xlu0 %v43_v4, %s1820_s15  ;;  %280 = vmatprep.mubr.f32.mxu0 %v1823_v9  ;;  %v182_v16 = vld [vmem:[%s2361_s2 + $0x18] sm:$0xff]  ;;  %v181_v17 = vld [vmem:[%s2361_s2 + $0x10] sm:$0xff]  ;;  %vm52_vm0 = vcmask 1039360   ;;  %vm71_vm1 = vcmask 908288  }
   0x7   :  { %369 = vmatprep.mubr.f32.mxu1 %v1823_v9  ;;  %1783 = vset.pattern.permute.xlu0 %v1824_v15  ;;  %vm89_vm2 = vcmask 900096   ;;  %v1936_v47 = vld [vmem:[%s2360_s1] sm:$0xff]  ;;  %vm203_vm3 = vcmask 130048   ;;  %v164_v52 = vld [vmem:[%s2360_s1 + $0x8] sm:$0xff]  ;;  %v165_v57 = vld [vmem:[%s2360_s1 + $0x10] sm:$0xff]  ;;  %vm1826_vm4 = vmmov 0  }
   0x8   :  { %1784 = vset.pattern.permute.xlu1 %v1824_v15  ;;  %vm627_vm5 = vcmask 7168   ;;  %vm632_vm6 = vcmask 15360   ;;  %vm637_vm7 = vcmask 23552   ;;  %vm643_vm8 = vcmask 261120   ;;  %s1827_s20 = smov 2   ;;  %s1829_s10 = smov 126  }
   0x9   :  { %67 = vrot.lane.b32.xlu1 %v34_v1, %s1821_s18  ;;  %vm731_vm9 = vcmask 31744   ;;  %vm744_vm10 = vcmask 1043456   ;;  %vm946_vm11 = vcmask 1041408  }
   0xa   :  { %83 = vrot.lane.b32.xlu0 %v33_v0, %s1822_s19 }
   0xd   :  { %85 = vrot.lane.b32.xlu1 %v43_v4, %s1822_s19 }
   0xe   :  { %44 = vrot.lane.b32.xlu0 %v42_v7, %s1820_s15 }
  0x11   :  { %63 = vrot.lane.b32.xlu1 %v33_v0, %s1821_s18 }
  0x12   :  { %81 = vrot.lane.b32.xlu0 %v42_v7, %s1822_s19 }
  0x15   :  { %111 = vrot.lane.b32.xlu1 %v109_v8, %s1820_s15 }
  0x16   :  { %113 = vrot.lane.b32.xlu0 %v1666_v2, %s1820_s15 }
  0x19   :  { %129 = vrot.lane.b32.xlu1 %v1666_v2, %s1821_s18 }
  0x1a   :  { %131 = vrot.lane.b32.xlu0 %v104_v6, %s1821_s18 }
  0x1d   :  { %146 = vrot.lane.b32.xlu1 %v109_v8, %s1822_s19 }
  0x1e   :  { %148 = vrot.lane.b32.xlu0 %v1666_v2, %s1822_s19 }
  0x21   :  { %50 = vrot.lane.b32.xlu1 %v34_v1, %s1820_s15 }
  0x22   :  { %69 = vrot.lane.b32.xlu0 %v62_v10, %s1821_s18 }
  0x25   :  { %87 = vrot.lane.b32.xlu1 %v34_v1, %s1822_s19  ;;  %v166_v1 = vld [vmem:[%s2360_s1 + $0x18] sm:$0xff] }
  0x26   :  { %115 = vrot.lane.b32.xlu0 %v110_v11, %s1820_s15 }
  0x29   :  { %117 = vrot.lane.b32.xlu1 %v1667_v5, %s1820_s15 }
  0x2a   :  { %133 = vrot.lane.b32.xlu0 %v1667_v5, %s1821_s18 }
  0x2d   :  { %135 = vrot.lane.b32.xlu1 %v128_v12, %s1821_s18 }
  0x2e   :  { %150 = vrot.lane.b32.xlu0 %v110_v11, %s1822_s19 }
  0x31   :  { %152 = vrot.lane.b32.xlu1 %v1667_v5, %s1822_s19 }
  0x32   :  { %185 = vperm.xlu0 %1783, %v179_v13  }
  0x35   :  { %190 = vperm.xlu1 %1784, %v180_v14  }
  0x36   :  { %200 = vperm.xlu0 %1783, %v182_v16  }
  0x39   :  { %195 = vperm.xlu1 %1784, %v181_v17  }
  0x74   :  { %v47_v18 = vpop.permute.xlu0 %46 }
  0x77   :  { %v66_v19 = vpop.permute.xlu1 %65 }
  0x78   :  { %v49_v20 = vpop.permute.xlu0 %48 }
  0x79   :  { %v54_v21 = vsel %vm52_vm0, %v47_v18, %v49_v20 }
  0x7a   :  { %60 = vst [vmem:[#allocation2 + $0x8] sm:$0xf0] %v54_v21 }
  0x7b   :  { %v68_v22 = vpop.permute.xlu1 %67 }
  0x7c   :  { %v73_v23 = vsel %vm71_vm1, %v66_v19, %v68_v22  ;;  %v84_v24 = vpop.permute.xlu0 %83 }
  0x7d   :  { %79 = vst [vmem:[#allocation2 + $0x38] sm:$0xf] %v73_v23 }
  0x7f   :  { %v86_v25 = vpop.permute.xlu1 %85 }
  0x80   :  { %v91_v26 = vsel %vm89_vm2, %v84_v24, %v86_v25  ;;  %v45_v27 = vpop.permute.xlu0 %44 }
  0x81   :  { %97 = vst [vmem:[#allocation2 + $0x38] sm:$0xf0] %v91_v26  ;;  %v53_v28 = vsel %vm52_vm0, %v45_v27, %v47_v18  ;;  %v168_v34 = vld [vmem:[#allocation2 + $0x8] sm:$0xff] }
  0x82   :  { %59 = vst [vmem:[#allocation2] sm:$0xf0] %v53_v28  ;;  %v1992_v28 = vld [vmem:[%s2364_s5] sm:$0x3f] }
  0x83   :  { %v64_v29 = vpop.permute.xlu1 %63 }
  0x84   :  { %v72_v30 = vsel %vm71_vm1, %v64_v29, %v66_v19  ;;  %v82_v31 = vpop.permute.xlu0 %81  ;;  %v485_v19 = vlaneseq }
  0x85   :  { %78 = vst [vmem:[#allocation2 + $0x30] sm:$0xf] %v72_v30  ;;  %v90_v32 = vsel %vm89_vm2, %v82_v31, %v84_v24 }
  0x86   :  { %96 = vst [vmem:[#allocation2 + $0x30] sm:$0xf0] %v90_v32 }
  0x87   :  { %v112_v33 = vpop.permute.xlu1 %111 }
  0x88   :  { %v174_v35 = vld [vmem:[#allocation2 + $0x38] sm:$0xff]  ;;  %v114_v36 = vpop.permute.xlu0 %113 }
  0x89   :  { %v1752_v37 = vpack.c.bf16 %v174_v35, %v168_v34  ;;  %v119_v38 = vsel %vm52_vm0, %v112_v33, %v114_v36  ;;  %v167_v42 = vld [vmem:[#allocation2] sm:$0xff] }
  0x8a   :  { %125 = vst [vmem:[#allocation2 + $0x18] sm:$0xf0] %v119_v38 }
  0x8b   :  { %v130_v39 = vpop.permute.xlu1 %129  ;;  %1753 = vmatprep.subr.bf16.mxu0 %v1752_v37 }
  0x8c   :  { %v132_v40 = vpop.permute.xlu0 %131 }
  0x8d   :  { %v137_v41 = vsel %vm71_vm1, %v130_v39, %v132_v40  ;;  %v173_v43 = vld [vmem:[#allocation2 + $0x30] sm:$0xff] }
  0x8e   :  { %143 = vst [vmem:[#allocation2 + $0x48] sm:$0xf] %v137_v41  ;;  %v1754_v45 = vpack.c.bf16 %v173_v43, %v167_v42 }
  0x8f   :  { %v147_v44 = vpop.permute.xlu1 %146 }
  0x90   :  { %v149_v46 = vpop.permute.xlu0 %148  ;;  %1755 = vmatpush1.bf16.msra.mxu0 %v1754_v45 }
  0x91   :  { %v154_v48 = vsel %vm89_vm2, %v147_v44, %v149_v46  ;;  %v170_v59 = vld [vmem:[#allocation2 + $0x18] sm:$0xff] }
  0x92   :  { %160 = vst [vmem:[#allocation2 + $0x48] sm:$0xf0] %v154_v48 }
  0x93   :  { %v51_v49 = vpop.permute.xlu1 %50  ;;  %1668 = vmatmul.mubr.msk.f32.vlgmr.msra.gmra.mrb[0].mxu0 %vm203_vm3, %v1936_v47 }
  0x94   :  { %v55_v50 = vsel %vm52_vm0, %v49_v20, %v51_v49  ;;  %v70_v51 = vpop.permute.xlu0 %69  ;;  %286 = vmatprep.mubr.f32.mxu0 %v1823_v9 }
  0x95   :  { %61 = vst [vmem:[#allocation2 + $0x10] sm:$0xf0] %v55_v50  ;;  %v74_v53 = vsel %vm71_vm1, %v68_v22, %v70_v51  ;;  %v1983_v22 = vshrl.u32 %v485_v19, 7 }
  0x96   :  { %80 = vst [vmem:[#allocation2 + $0x40] sm:$0xf] %v74_v53 }
  0x97   :  { %v88_v54 = vpop.permute.xlu1 %87  ;;  %1669 = vmatmul.mubr.msk.f32.gmra.mrb[2].mxu0 %vm203_vm3, %v164_v52  ;;  %v491_v24 = vsub.s32 1, %v1983_v22  ;;  %v487_v26 = vsub.s32 0, %v1983_v22  ;;  %v495_v38 = vsub.s32 2, %v1983_v22 }
  0x98   :  { %v92_v55 = vsel %vm89_vm2, %v86_v25, %v88_v54  ;;  %v116_v56 = vpop.permute.xlu0 %115  ;;  %292 = vmatprep.mubr.f32.mxu0 %v1823_v9 }
  0x99   :  { %98 = vst [vmem:[#allocation2 + $0x40] sm:$0xf0] %v92_v55  ;;  %v120_v58 = vsel %vm52_vm0, %v114_v36, %v116_v56  ;;  %v176_v60 = vld [vmem:[#allocation2 + $0x48] sm:$0xff]  ;;  %v492_v31 = vrot.slane %v1992_v28, %v491_v24  ;;  %v488_v34 = vrot.slane %v1992_v28, %v487_v26  ;;  %v2015_v44 = vrot.slane %v1992_v28, %v495_v38 }
  0x9a   :  { %126 = vst [vmem:[#allocation2 + $0x20] sm:$0xf0] %v120_v58  ;;  %v1756_v62 = vpack.c.bf16 %v176_v60, %v170_v59 }
  0x9b   :  { %v118_v61 = vpop.permute.xlu1 %117  ;;  %1670 = vmatmul.mubr.msk.f32.gmra.mrb[4].mxu0 %vm203_vm3, %v165_v57 }
  0x9c   :  { %v121_v63 = vsel %vm52_vm0, %v116_v56, %v118_v61  ;;  %v134_v0 = vpop.permute.xlu0 %133  ;;  %1757 = vmatprep.subr.bf16.mxu1 %v1756_v62  ;;  %298 = vmatprep.mubr.f32.mxu0 %v1823_v9  ;;  %v169_v5 = vld [vmem:[#allocation2 + $0x10] sm:$0xff] }
  0x9d   :  { %127 = vst [vmem:[#allocation2 + $0x28] sm:$0xf0] %v121_v63  ;;  %v138_v2 = vsel %vm71_vm1, %v132_v40, %v134_v0 }
  0x9e   :  { %144 = vst [vmem:[#allocation2 + $0x50] sm:$0xf] %v138_v2 }
  0x9f   :  { %v136_v3 = vpop.permute.xlu1 %135  ;;  %1671 = vmatmul.mubr.msk.f32.gmra.mrb[6].mxu0 %vm203_vm3, %v166_v1 }
  0xa0   :  { %v139_v4 = vsel %vm71_vm1, %v134_v0, %v136_v3  ;;  %v175_v6 = vld [vmem:[#allocation2 + $0x40] sm:$0xff]  ;;  %v151_v7 = vpop.permute.xlu0 %150  ;;  %458 = vmatprep.mubr.f32.mxu0 %v1823_v9  ;;  %v499_v3 = vsub.s32 3, %v1983_v22 }
  0xa1   :  { %145 = vst [vmem:[#allocation2 + $0x58] sm:$0xf] %v139_v4  ;;  %v1758_v8 = vpack.c.bf16 %v175_v6, %v169_v5  ;;  %v155_v10 = vsel %vm89_vm2, %v149_v46, %v151_v7  ;;  %v171_v17 = vld [vmem:[#allocation2 + $0x20] sm:$0xff]  ;;  %v503_v5 = vsub.s32 4, %v1983_v22 }
  0xa2   :  { %161 = vst [vmem:[#allocation2 + $0x50] sm:$0xf0] %v155_v10  ;;  %v2061_v19 = vrot.slane %v1992_v28, %v499_v3 }
  0xa3   :  { %1759 = vmatpush1.bf16.msra.mxu1 %v1758_v8  ;;  %v153_v11 = vpop.permute.xlu1 %152 }
  0xa4   :  { %v156_v12 = vsel %vm89_vm2, %v151_v7, %v153_v11  ;;  %v172_v14 = vld [vmem:[#allocation2 + $0x28] sm:$0xff] }
  0xa5   :  { %162 = vst [vmem:[#allocation2 + $0x58] sm:$0xf0] %v156_v12  ;;  %v507_v12 = vsub.s32 5, %v1983_v22 }
  0xa6   :  { %1672 = vmatmul.mubr.msk.f32.vlgmr.msra.gmra.mrb[0].mxu1 %vm203_vm3, %v1936_v47 }
  0xa7   :  { %375 = vmatprep.mubr.f32.mxu1 %v1823_v9 }
  0xa9   :  { %v177_v13 = vld [vmem:[#allocation2 + $0x50] sm:$0xff] }
  0xaa   :  { %1673 = vmatmul.mubr.msk.f32.gmra.mrb[2].mxu1 %vm203_vm3, %v164_v52  ;;  %v1762_v18 = vpack.c.bf16 %v177_v13, %v171_v17 }
  0xab   :  { %381 = vmatprep.mubr.f32.mxu1 %v1823_v9 }
  0xac   :  { %v178_v15 = vld [vmem:[#allocation2 + $0x58] sm:$0xff] }
  0xad   :  { %v1760_v16 = vpack.c.bf16 %v178_v15, %v172_v14 }
  0xae   :  { %1674 = vmatmul.mubr.msk.f32.gmra.mrb[4].mxu1 %vm203_vm3, %v165_v57 }
  0xaf   :  { %1761 = vmatprep.subr.bf16.mxu0 %v1760_v16  ;;  %387 = vmatprep.mubr.f32.mxu1 %v1823_v9 }
  0xb0   :  { %1763 = vmatpush1.bf16.msra.mxu0 %v1762_v18 }
  0xb1   :  { %v1987_v27 = vpop.permute.xlu0 %185 }
  0xb2   :  { %1675 = vmatmul.mubr.msk.f32.gmra.mrb[6].mxu1 %vm203_vm3, %v166_v1 }
  0xb3   :  { %1676 = vmatmul.mubr.msk.f32.vlgmr.msra.gmra.mrb[8].mxu0 %vm203_vm3, %v1936_v47  ;;  %1741 = vmatprep.mubr.msk.f32.mxu1 %vm1826_vm4, %v1823_v9 }
  0xb4   :  { %464 = vmatprep.mubr.f32.mxu0 %v1823_v9  ;;  %v2002_v35 = vpop.permute.xlu1 %190 }
  0xb5   :  { %v2025_v53 = vpop.permute.xlu0 %200 }
  0xb7   :  { %1677 = vmatmul.mubr.msk.f32.gmra.mrb[10].mxu0 %vm203_vm3, %v164_v52 }
  0xb8   :  { %470 = vmatprep.mubr.f32.mxu0 %v1823_v9  ;;  %v2023_v51 = vpop.permute.xlu1 %195 }
  0xbb   :  { %1678 = vmatmul.mubr.msk.f32.gmra.mrb[12].mxu0 %vm203_vm3, %v165_v57 }
  0xbc   :  { %476 = vmatprep.mubr.f32.mxu0 %v1823_v9 }
  0xbf   :  { %1679 = vmatmul.mubr.msk.f32.gmra.mrb[14].mxu0 %vm203_vm3, %v166_v1 }
  0xc0   :  { %1112 = vmatprep.mubr.f32.mxu0 %v1823_v9 }
 0x166   :  { %v282_v20 = vpop.f32.mrb[0].mxu0 }
 0x167   :  { %v284_v21 = vpop.f32.mrb[1].mxu0  ;;  %v1999_v33 = vadd.f32 %v282_v20, %v1987_v27  ;;  %v2064_v20 = vrot.slane %v1992_v28, %v503_v5 }
 0x168   :  { %v1995_v30 = vadd.f32 %v284_v21, %v1987_v27 }
 0x169   :  { %v515_v40 = vmul.f32 %v488_v34, %v1999_v33 }
 0x16a   :  { %v288_v23 = vpop.f32.mrb[2].mxu0  ;;  %v516_v37 = vmul.f32 %v492_v31, %v1995_v30 }
 0x16b   :  { %v290_v25 = vpop.f32.mrb[3].mxu0  ;;  %v2008_v41 = vadd.f32 %v288_v23, %v2002_v35  ;;  %v539_v45 = vmul.f32 %v515_v40, %v1999_v33 }
 0x16c   :  { %v2011_v42 = vadd.f32 %v290_v25, %v2002_v35  ;;  %v540_v43 = vmul.f32 %v516_v37, %v1995_v30  ;;  %v563_v52 = vadd.f32 %v516_v37, %v515_v40 }
 0x16d   :  { %v521_v47 = vmul.f32 %v488_v34, %v2008_v41 }
 0x16e   :  { %v294_v29 = vpop.f32.mrb[4].mxu0  ;;  %v522_v48 = vmul.f32 %v492_v31, %v2011_v42  ;;  %v595_v55 = vadd.f32 %v540_v43, %v539_v45 }
 0x16f   :  { %v296_v32 = vpop.f32.mrb[5].mxu0  ;;  %v545_v57 = vmul.f32 %v521_v47, %v2008_v41  ;;  %v2032_v59 = vadd.f32 %v294_v29, %v2023_v51 }
 0x170   :  { %v546_v58 = vmul.f32 %v522_v48, %v2011_v42  ;;  %v2035_v60 = vadd.f32 %v296_v32, %v2023_v51  ;;  %v567_v7 = vadd.f32 %v522_v48, %v521_v47 }
 0x171   :  { %v527_v11 = vmul.f32 %v488_v34, %v2032_v59 }
 0x172   :  { %v300_v36 = vpop.f32.mrb[6].mxu0  ;;  %v599_v10 = vadd.f32 %v546_v58, %v545_v57  ;;  %v528_v16 = vmul.f32 %v492_v31, %v2035_v60 }
 0x173   :  { %v302_v39 = vpop.f32.mrb[7].mxu0  ;;  %v2042_v1 = vadd.f32 %v300_v36, %v2025_v53  ;;  %v551_v32 = vmul.f32 %v527_v11, %v2032_v59 }
 0x174   :  { %v2045_v2 = vadd.f32 %v302_v39, %v2025_v53  ;;  %v571_v29 = vadd.f32 %v528_v16, %v527_v11  ;;  %v552_v38 = vmul.f32 %v528_v16, %v2035_v60 }
 0x175   :  { %v533_v17 = vmul.f32 %v488_v34, %v2042_v1 }
 0x176   :  { %v534_v18 = vmul.f32 %v492_v31, %v2045_v2  ;;  %v2073_v31 = vrot.slane %v1992_v28, %v507_v12  ;;  %v603_v58 = vadd.f32 %v552_v38, %v551_v32 }
 0x177   :  { %v557_v39 = vmul.f32 %v533_v17, %v2042_v1 }
 0x178   :  { %v558_v40 = vmul.f32 %v534_v18, %v2045_v2 }
 0x179   :  { %v371_v46 = vpop.f32.mrb[0].mxu1 }
 0x17a   :  { %v2021_v49 = vadd.f32 %v371_v46, %v1987_v27  ;;  %v373_v50 = vpop.f32.mrb[1].mxu1  ;;  %v575_v46 = vadd.f32 %v534_v18, %v533_v17  ;;  %v607_v3 = vadd.f32 %v558_v40, %v557_v39 }
 0x17b   :  { %v2069_v25 = vadd.f32 %v373_v50, %v1987_v27 }
 0x17c   :  { %v517_v54 = vmul.f32 %v2015_v44, %v2021_v49 }
 0x17d   :  { %v377_v56 = vpop.f32.mrb[2].mxu1 }
 0x17e   :  { %v2038_v61 = vadd.f32 %v377_v56, %v2002_v35  ;;  %v379_v62 = vpop.f32.mrb[3].mxu1  ;;  %v541_v63 = vmul.f32 %v517_v54, %v2021_v49  ;;  %v564_v0 = vadd.f32 %v563_v52, %v517_v54  ;;  %v518_v54 = vmul.f32 %v2061_v19, %v2069_v25 }
 0x17f   :  { %v2082_v43 = vadd.f32 %v379_v62, %v2002_v35 }
 0x180   :  { %v596_v4 = vadd.f32 %v595_v55, %v541_v63  ;;  %565 = vadd.xlane.f32.xlu1 %v564_v0  ;;  %v523_v6 = vmul.f32 %v2015_v44, %v2038_v61 }
 0x181   :  { %v383_v8 = vpop.f32.mrb[4].mxu1 }
 0x182   :  { %v2054_v13 = vadd.f32 %v383_v8, %v2023_v51  ;;  %v385_v14 = vpop.f32.mrb[5].mxu1  ;;  %597 = vadd.xlane.f32.xlu0 %v596_v4  ;;  %v547_v15 = vmul.f32 %v523_v6, %v2038_v61  ;;  %v568_v21 = vadd.f32 %v567_v7, %v523_v6  ;;  %v524_v4 = vmul.f32 %v2061_v19, %v2082_v43 }
 0x183   :  { %v542_v8 = vmul.f32 %v518_v54, %v2069_v25 }
 0x184   :  { %v600_v23 = vadd.f32 %v599_v10, %v547_v15  ;;  %v529_v24 = vmul.f32 %v2015_v44, %v2054_v13  ;;  %v2111_v10 = vadd.f32 %v385_v14, %v2023_v51 }
 0x185   :  { %v389_v26 = vpop.f32.mrb[6].mxu1 }
 0x186   :  { %v2076_v34 = vadd.f32 %v389_v26, %v2025_v53  ;;  %v391_v36 = vpop.f32.mrb[7].mxu1  ;;  %v460_v37 = vpop.f32.mrb[8].mxu0  ;;  %569 = vadd.xlane.f32.xlu0 %v568_v21  ;;  %601 = vadd.xlane.f32.xlu1 %v600_v23  ;;  %v572_v48 = vadd.f32 %v571_v29, %v529_v24  ;;  %v553_v52 = vmul.f32 %v529_v24, %v2054_v13 }
 0x187   :  { %v2085_v45 = vadd.f32 %v460_v37, %v1987_v27  ;;  %v462_v28 = vpop.f32.mrb[9].mxu0  ;;  %v2116_v12 = vadd.f32 %v391_v36, %v2025_v53  ;;  %v548_v26 = vmul.f32 %v524_v4, %v2082_v43  ;;  %v530_v38 = vmul.f32 %v2061_v19, %v2111_v10 }
 0x188   :  { %v2088_v47 = vadd.f32 %v462_v28, %v1987_v27  ;;  %v535_v50 = vmul.f32 %v2015_v44, %v2076_v34  ;;  %v604_v6 = vadd.f32 %v603_v58, %v553_v52 }
 0x189   :  { %v519_v55 = vmul.f32 %v2064_v20, %v2085_v45 }
 0x18a   :  { %v466_v56 = vpop.f32.mrb[10].mxu0  ;;  %573 = vadd.xlane.f32.xlu0 %v572_v48  ;;  %v576_v57 = vadd.f32 %v575_v46, %v535_v50  ;;  %v559_v62 = vmul.f32 %v535_v50, %v2076_v34  ;;  %v520_v27 = vmul.f32 %v2073_v31, %v2088_v47  ;;  %v536_v46 = vmul.f32 %v2061_v19, %v2116_v12 }
 0x18b   :  { %v543_v63 = vmul.f32 %v519_v55, %v2085_v45  ;;  %v2102_v44 = vadd.f32 %v466_v56, %v2002_v35  ;;  %v468_v0 = vpop.f32.mrb[11].mxu0  ;;  %v579_v7 = vadd.f32 %v519_v55, %v518_v54  ;;  %v554_v19 = vmul.f32 %v530_v38, %v2111_v10 }
 0x18c   :  { %v2107_v5 = vadd.f32 %v468_v0, %v2002_v35  ;;  %577 = vadd.xlane.f32.xlu1 %v576_v57  ;;  %v608_v16 = vadd.f32 %v607_v3, %v559_v62  ;;  %v544_v17 = vmul.f32 %v520_v27, %v2088_v47 }
 0x18d   :  { %v525_v11 = vmul.f32 %v2064_v20, %v2102_v44  ;;  %v611_v24 = vadd.f32 %v543_v63, %v542_v8  ;;  %v580_v32 = vadd.f32 %v579_v7, %v520_v27 }
 0x18e   :  { %v472_v15 = vpop.f32.mrb[12].mxu0  ;;  %605 = vadd.xlane.f32.xlu0 %v604_v6  ;;  %v526_v35 = vmul.f32 %v2073_v31, %v2107_v5 }
 0x18f   :  { %v549_v18 = vmul.f32 %v525_v11, %v2102_v44  ;;  %v2123_v21 = vadd.f32 %v472_v15, %v2023_v51  ;;  %v474_v14 = vpop.f32.mrb[13].mxu0  ;;  %v583_v23 = vadd.f32 %v525_v11, %v524_v4  ;;  %v612_v50 = vadd.f32 %v611_v24, %v544_v17  ;;  %v833_v15 = vld [vmem:[%s2362_s3] sm:$0xff] }
 0x190   :  { %v2127_v29 = vadd.f32 %v474_v14, %v2023_v51  ;;  %609 = vadd.xlane.f32.xlu1 %v608_v16  ;;  %v550_v40 = vmul.f32 %v526_v35, %v2107_v5  ;;  %v834_v16 = vld [vmem:[%s2362_s3 + $0x8] sm:$0xff] }
 0x191   :  { %v531_v36 = vmul.f32 %v2064_v20, %v2123_v21  ;;  %v584_v37 = vadd.f32 %v583_v23, %v526_v35  ;;  %v615_v28 = vadd.f32 %v549_v18, %v548_v26  ;;  %v836_v35 = vld [vmem:[%s2362_s3 + $0x18] sm:$0xff] }
 0x192   :  { %v478_v39 = vpop.f32.mrb[14].mxu0  ;;  %581 = vadd.xlane.f32.xlu0 %v580_v32  ;;  %v532_v55 = vmul.f32 %v2073_v31, %v2127_v29 }
 0x193   :  { %v2137_v51 = vadd.f32 %v478_v39, %v2025_v53  ;;  %v480_v48 = vpop.f32.mrb[15].mxu0  ;;  %v555_v52 = vmul.f32 %v531_v36, %v2123_v21  ;;  %v587_v56 = vadd.f32 %v531_v36, %v530_v38  ;;  %v616_v58 = vadd.f32 %v615_v28, %v550_v40 }
 0x194   :  { %v2141_v54 = vadd.f32 %v480_v48, %v2025_v53  ;;  %585 = vadd.xlane.f32.xlu1 %v584_v37  ;;  %v560_v53 = vmul.f32 %v536_v46, %v2116_v12  ;;  %v556_v3 = vmul.f32 %v532_v55, %v2127_v29 }
 0x195   :  { %v537_v57 = vmul.f32 %v2064_v20, %v2137_v51  ;;  %v588_v0 = vadd.f32 %v587_v56, %v532_v55  ;;  %v619_v4 = vadd.f32 %v555_v52, %v554_v19 }
 0x196   :  { %613 = vadd.xlane.f32.xlu0 %v612_v50  ;;  %v538_v62 = vmul.f32 %v2073_v31, %v2141_v54  ;;  %v1825_v31 = vmov 0.0|0.0  }
 0x197   :  { %v561_v27 = vmul.f32 %v537_v57, %v2137_v51  ;;  %v591_v63 = vadd.f32 %v537_v57, %v536_v46  ;;  %v620_v8 = vadd.f32 %v619_v4, %v556_v3  ;;  %1764 = vmatprep.subr.bf16.mxu1 %v1825_v31 }
 0x198   :  { %617 = vadd.xlane.f32.xlu1 %v616_v58  ;;  %v562_v20 = vmul.f32 %v538_v62, %v2141_v54 }
 0x199   :  { %v592_v6 = vadd.f32 %v591_v63, %v538_v62  ;;  %v623_v7 = vadd.f32 %v561_v27, %v560_v53 }
 0x19a   :  { %589 = vadd.xlane.f32.xlu0 %v588_v0 }
 0x19b   :  { %v624_v11 = vadd.f32 %v623_v7, %v562_v20  ;;  %v642_v20 = vld [vmem:[%s2365_s6] sm:$0xf] }
 0x19c   :  { %593 = vadd.xlane.f32.xlu1 %v592_v6 }
 0x19e   :  { %621 = vadd.xlane.f32.xlu0 %v620_v8 }
 0x1a0   :  { %625 = vadd.xlane.f32.xlu1 %v624_v11 }
 0x1b1   :  { %839 = vperm.xlu1 %1784, %v833_v15   ;;  %v835_v15 = vld [vmem:[%s2362_s3 + $0x10] sm:$0xff] }
 0x1b5   :  { %844 = vperm.xlu1 %1784, %v834_v16   ;;  %v726_v16 = vld [vmem:[%s2366_s7] sm:$0xff] }
 0x1b9   :  { %854 = vperm.xlu1 %1784, %v836_v35  }
 0x20d   :  { %v566_v18 = vpop.xlane.xlu1 %565 }
 0x20f   :  { %v598_v17 = vpop.xlane.xlu0 %597 }
 0x213   :  { %v570_v14 = vpop.xlane.xlu0 %569  ;;  %v602_v23 = vpop.xlane.xlu1 %601 }
 0x217   :  { %v574_v24 = vpop.xlane.xlu0 %573 }
 0x219   :  { %v578_v26 = vpop.xlane.xlu1 %577 }
 0x21b   :  { %v606_v32 = vpop.xlane.xlu0 %605 }
 0x21d   :  { %v610_v36 = vpop.xlane.xlu1 %609 }
 0x21f   :  { %v582_v37 = vpop.xlane.xlu0 %581 }
 0x220   :  { %v628_v39 = vsel %vm627_vm5, %v566_v18, %v582_v37  ;;  %v1828_v37 = vmov 1983009808  }
 0x221   :  { %v586_v38 = vpop.xlane.xlu1 %585  ;;  %v633_v46 = vsel %vm632_vm6, %v628_v39, %v598_v17 }
 0x222   :  { %v629_v40 = vsel %vm627_vm5, %v570_v14, %v586_v38  ;;  %v915_v38 = vunpack.c.l.s4 %v1828_v37 }
 0x223   :  { %v614_v28 = vpop.xlane.xlu0 %613  ;;  %v634_v50 = vsel %vm632_vm6, %v629_v40, %v602_v23 }
 0x224   :  { %v638_v52 = vsel %vm637_vm7, %v633_v46, %v614_v28  ;;  %v916_v39 = vunpack.c.0.s8 %v915_v38 }
 0x225   :  { %v618_v48 = vpop.xlane.xlu1 %617 }
 0x226   :  { %v639_v55 = vsel %vm637_vm7, %v634_v50, %v618_v48  ;;  %v919_v28 = vsub.s32 %v916_v39, %v1983_v22 }
 0x227   :  { %v1765_v56 = vpack.c.bf16 %v639_v55, %v638_v52  ;;  %v590_v57 = vpop.xlane.xlu0 %589 }
 0x228   :  { %v630_v58 = vsel %vm627_vm5, %v574_v24, %v590_v57  ;;  %v727_v24 = vld [vmem:[%s2366_s7 + $0x8] sm:$0xff] }
 0x229   :  { %v594_v19 = vpop.xlane.xlu1 %593  ;;  %1766 = vmatpush3.bf16.msra.mxu1 %v1765_v56  ;;  %v635_v63 = vsel %vm632_vm6, %v630_v58, %v606_v32  ;;  %v729_v32 = vld [vmem:[%s2366_s7 + $0x18] sm:$0xff] }
 0x22a   :  { %v631_v62 = vsel %vm627_vm5, %v578_v26, %v594_v19  ;;  %1767 = vmatprep.subr.bf16.mxu1 %v1825_v31  ;;  %v728_v26 = vld [vmem:[%s2366_s7 + $0x10] sm:$0xff] }
 0x22b   :  { %v622_v27 = vpop.xlane.xlu0 %621  ;;  %v636_v53 = vsel %vm632_vm6, %v631_v62, %v610_v36  ;;  %v909_v36 = vld [vmem:[%s2367_s8] sm:$0xff]  ;;  %v1686_v62 = vld.sshfl [vmem:[%s2367_s8 + $0x8] sm:$0x33 pattern:$0x76325410] }
 0x22c   :  { %v640_v3 = vsel %vm637_vm7, %v635_v63, %v622_v27  ;;  %v913_v40 = vcombine.high %v909_v36, %v909_v36  ;;  %v920_v46 = vrot.slane %v909_v36, %v919_v28  ;;  %v937_v27 = vcombine.high %v1686_v62, %v1686_v62 }
 0x22d   :  { %v626_v0 = vpop.xlane.xlu1 %625 }
 0x22e   :  { %v641_v4 = vsel %vm637_vm7, %v636_v53, %v626_v0  ;;  %v2204_v48 = vrot.slane %v913_v40, %v919_v28  ;;  %v928_v50 = vcombine.high %v920_v46, %v920_v46 }
 0x22f   :  { %v1768_v6 = vpack.c.bf16 %v641_v4, %v640_v3  ;;  %v861_v3 = vld [vmem:[%s2363_s4] sm:$0xff] }
 0x230   :  { %v929_v52 = vcombine.high %v2204_v48, %v2204_v48 }
 0x231   :  { %1769 = vmatpush3.bf16.msra.mxu1 %v1768_v6  ;;  %v840_v22 = vpop.permute.xlu1 %839 }
 0x232   :  { %1693 = vmatprep.subr.msk.mxu0 %vm946_vm11, %v929_v52 }
 0x233   :  { %1694 = vmatpush1.msk.msra.mxu0 %vm946_vm11, %v2204_v48 }
 0x234   :  { %1742 = vmatmul.mubr.msk.f32.vlgmr.msra.gmra.mrb[8].mxu1 %vm643_vm8, %v642_v20  ;;  %1705 = vmatprep.subr.msk.mxu0 %vm946_vm11, %v928_v50  ;;  %v862_v20 = vld [vmem:[%s2363_s4 + $0x8] sm:$0xff] }
 0x235   :  { %1746 = vmatprep.mubr.msk.f32.mxu1 %vm731_vm9, %v726_v16  ;;  %v845_v55 = vpop.permute.xlu1 %844 }
 0x239   :  { %v855_v6 = vpop.permute.xlu1 %854 }
 0x307   :  { %v713_v7 = vpop.f32.mrb[8].mxu1 }
 0x308   :  { %v717_v8 = vmul.f32 0.00048828125, %v713_v7  ;;  %v1743_v11 = vpop.f32.mrb[9].mxu1 }
 0x309   :  { %v864_v11 = vld [vmem:[%s2363_s4 + $0x18] sm:$0xff] }
 0x30a   :  { %v718_v31 = vmul.f32 %v717_v8, %v717_v8 }
 0x30c   :  { %720 = vrot.lane.b32.xlu0 %v718_v31, %s1827_s20 }
 0x310   :  { %849 = vperm.xlu0 %1783, %v835_v15  }
 0x37e   :  { %v721_v35 = vpop.permute.xlu0 %720 }
 0x37f   :  { %v723_v17 = vsub.f32 %v717_v8, %v721_v35 }
 0x381   :  { %v724_v18 = vadd.f32 1e-05, %v723_v17 }
 0x383   :  { %1794 = vrsqrt.f32 %v724_v18 }
 0x38d   :  { %v1795_v14 = vpop.eup %1794 }
 0x38e   :  { %v730_v23 = vsel %vm632_vm6, %v717_v8, %v1795_v14  ;;  %v863_v8 = vld [vmem:[%s2363_s4 + $0x10] sm:$0xff]  ;;  %s1830_s4 = smov [#allocation3]  }
 0x38f   :  { %1744 = vmatprep.subr.msk.mxu1 %vm744_vm10, %v730_v23  ;;  %v850_v53 = vpop.permute.xlu0 %849  ;;  %s1655_s16 = sshll.u32 %s1830_s4, 4  ;;  %s1656_s16 = int_to_ptr.vmem [resolvable:$true] %s1655_s16 }
 0x390   :  { %1745 = vmatpush3.msk.msra.mxu1 %vm744_vm10, %v730_v23  ;;  %s1796_s17 = scalar_lea.vmem %s1656_s16, 3072  ;;  %p1801_p1 = scmp.lt.s32.totalorder %s1656_s16, %s1656_s16 }
 0x391   :  { %1747 = vmatmul.mubr.msk.f32.vlgmr.msra.gmra.mrb[10].mxu1 %vm731_vm9, %v727_v24  ;;  %1687 = vmatprep.subr.msk.mxu1 %vm946_vm11, %v928_v50  ;;  %p1797_p0 = scmp.ne.s32.totalorder %s1656_s16, %s1796_s17  ;;  %p1802_p2 = scmp.lt.s32.totalorder %s1796_s17, %s1796_s17 }
 0x392   :  { %1749 = vmatprep.mubr.msk.f32.mxu1 %vm731_vm9, %v728_v26  ;;  %1688 = vmatpush1.msk.msra.mxu1 %vm946_vm11, %v920_v46 }
 0x393   :  { %1699 = vmatprep.subr.msk.mxu1 %vm946_vm11, %v937_v27  ;;  %p1803_p3 = por %p1802_p2, %p1801_p1 }
 0x395   :  { %1750 = vmatmul.mubr.msk.f32.gmra.mrb[12].mxu1 %vm731_vm9, %v729_v32  ;;  %p1804_p4 = pnand %p1803_p3, %p1797_p0 }
 0x396   :  { %1023 = vmatprep.mubr.f32.mxu1 %v1823_v9 }
 0x464   :  { %v1748_v56 = vpop.f32.mrb[10].mxu1 }
 0x465   :  { %v858_v57 = vmul.f32 %v1748_v56, %v845_v55  ;;  %v814_v19 = vpop.f32.mrb[11].mxu1 }
 0x466   :  { %v857_v58 = vmul.f32 %v840_v22, %v814_v19 }
 0x467   :  { %871 = vrot.lane.b32.xlu1 %v858_v57, %s1829_s10 }
 0x468   :  { %869 = vrot.lane.b32.xlu0 %v857_v58, %s1829_s10  ;;  %v2217_v63 = vpop.f32.mrb[12].mxu1 }
 0x469   :  { %v824_v0 = vpop.f32.mrb[13].mxu1  ;;  %v860_v7 = vmul.f32 %v2217_v63, %v855_v6 }
 0x46a   :  { %v859_v4 = vmul.f32 %v850_v53, %v824_v0 }
 0x46c   :  { %887 = vperm.xlu0 %1783, %v861_v3   ;;  %873 = vrot.lane.b32.xlu1 %v859_v4, %s1829_s10 }
 0x470   :  { %892 = vperm.xlu0 %1783, %v862_v20   ;;  %875 = vrot.lane.b32.xlu1 %v860_v7, %s1829_s10 }
 0x474   :  { %897 = vperm.xlu0 %1783, %v863_v8   ;;  %902 = vperm.xlu1 %1784, %v864_v11  }
 0x4d9   :  { %v872_v31 = vpop.permute.xlu1 %871 }
 0x4da   :  { %v870_v15 = vpop.permute.xlu0 %869  ;;  %v882_v23 = vmul.f32 %v1748_v56, %v872_v31 }
 0x4db   :  { %1689 = vmatmul.mubr.msk.f32.vlgmr.msra.gmra.mrb[14].mxu1 %vm632_vm6, %v870_v15  ;;  %1695 = vmatmul.mubr.msk.f32.vlgmr.msra.gmra.mrb[16].mxu0 %vm632_vm6, %v870_v15  ;;  %v881_v17 = vmul.f32 %v870_v15, %v814_v19 }
 0x4dc   :  { %1029 = vmatprep.mubr.f32.mxu1 %v1823_v9  ;;  %1118 = vmatprep.mubr.f32.mxu0 %v1823_v9 }
 0x4dd   :  { %1700 = vmatpush1.msk.msra.mxu1 %vm946_vm11, %v1686_v62  ;;  %1706 = vmatpush1.msk.msra.mxu0 %vm946_vm11, %v920_v46 }
 0x4de   :  { %1711 = vmatprep.subr.msk.mxu1 %vm946_vm11, %v929_v52  ;;  %1717 = vmatprep.subr.msk.mxu0 %vm946_vm11, %v937_v27  ;;  %v874_v16 = vpop.permute.xlu1 %873 }
 0x4df   :  { %1690 = vmatmul.mubr.msk.f32.gmra.mrb[16].mxu1 %vm632_vm6, %v872_v31  ;;  %1696 = vmatmul.mubr.msk.f32.gmra.mrb[18].mxu0 %vm632_vm6, %v872_v31  ;;  %v883_v32 = vmul.f32 %v874_v16, %v824_v0 }
 0x4e0   :  { %1035 = vmatprep.mubr.f32.mxu1 %v1823_v9  ;;  %1124 = vmatprep.mubr.f32.mxu0 %v1823_v9 }
 0x4e2   :  { %v876_v35 = vpop.permute.xlu1 %875 }
 0x4e3   :  { %1691 = vmatmul.mubr.msk.f32.gmra.mrb[18].mxu1 %vm632_vm6, %v874_v16  ;;  %1697 = vmatmul.mubr.msk.f32.gmra.mrb[20].mxu0 %vm632_vm6, %v874_v16  ;;  %v884_v39 = vmul.f32 %v2217_v63, %v876_v35 }
 0x4e4   :  { %1041 = vmatprep.mubr.f32.mxu1 %v1823_v9  ;;  %1130 = vmatprep.mubr.f32.mxu0 %v1823_v9 }
 0x4e7   :  { %1692 = vmatmul.mubr.msk.f32.gmra.mrb[20].mxu1 %vm632_vm6, %v876_v35  ;;  %1698 = vmatmul.mubr.msk.f32.gmra.mrb[22].mxu0 %vm632_vm6, %v876_v35 }
 0x4e8   :  { %1201 = vmatprep.mubr.f32.mxu1 %v1823_v9  ;;  %1326 = vmatprep.mubr.f32.mxu0 %v1823_v9 }
 0x4eb   :  { %v888_v18 = vpop.permute.xlu0 %887  ;;  %1701 = vmatmul.mubr.msk.f32.vlgmr.msra.gmra.mrb[22].mxu1 %vm632_vm6, %v870_v15 }
 0x4ec   :  { %v905_v14 = vsub.f32 %v888_v18, %v881_v17  ;;  %1207 = vmatprep.mubr.f32.mxu1 %v1823_v9  ;;  %1712 = vmatpush1.msk.msra.mxu1 %vm946_vm11, %v2204_v48 }
 0x4ee   :  { %1707 = vmatmul.mubr.msk.f32.vlgmr.msra.gmra.mrb[24].mxu0 %vm632_vm6, %v905_v14 }
 0x4ef   :  { %v893_v24 = vpop.permute.xlu0 %892  ;;  %1702 = vmatmul.mubr.msk.f32.gmra.mrb[24].mxu1 %vm632_vm6, %v872_v31  ;;  %1332 = vmatprep.mubr.f32.mxu0 %v1823_v9 }
 0x4f0   :  { %v906_v26 = vsub.f32 %v893_v24, %v882_v23  ;;  %1213 = vmatprep.mubr.f32.mxu1 %v1823_v9  ;;  %1718 = vmatpush1.msk.msra.mxu0 %vm946_vm11, %v1686_v62 }
 0x4f2   :  { %1708 = vmatmul.mubr.msk.f32.gmra.mrb[26].mxu0 %vm632_vm6, %v906_v26 }
 0x4f3   :  { %v898_v36 = vpop.permute.xlu0 %897  ;;  %1703 = vmatmul.mubr.msk.f32.gmra.mrb[26].mxu1 %vm632_vm6, %v874_v16  ;;  %1338 = vmatprep.mubr.f32.mxu0 %v1823_v9  ;;  %v903_v38 = vpop.permute.xlu1 %902 }
 0x4f4   :  { %v907_v37 = vsub.f32 %v898_v36, %v883_v32  ;;  %1219 = vmatprep.mubr.f32.mxu1 %v1823_v9  ;;  %v908_v40 = vsub.f32 %v903_v38, %v884_v39 }
 0x4f6   :  { %1709 = vmatmul.mubr.msk.f32.gmra.mrb[28].mxu0 %vm632_vm6, %v907_v37 }
 0x4f7   :  { %1704 = vmatmul.mubr.msk.f32.gmra.mrb[28].mxu1 %vm632_vm6, %v876_v35  ;;  %1344 = vmatprep.mubr.f32.mxu0 %v1823_v9 }
 0x4f8   :  { %1415 = vmatprep.mubr.f32.mxu1 %v1823_v9 }
 0x4fa   :  { %1710 = vmatmul.mubr.msk.f32.gmra.mrb[30].mxu0 %vm632_vm6, %v908_v40 }
 0x4fb   :  { %1713 = vmatmul.mubr.msk.f32.vlgmr.msra.gmra.mrb[30].mxu1 %vm632_vm6, %v905_v14  ;;  %1504 = vmatprep.mubr.f32.mxu0 %v1823_v9 }
 0x4fc   :  { %1421 = vmatprep.mubr.f32.mxu1 %v1823_v9 }
 0x4fe   :  { %1719 = vmatmul.mubr.msk.f32.vlgmr.msra.gmra.mrb[32].mxu0 %vm632_vm6, %v905_v14 }
 0x4ff   :  { %1714 = vmatmul.mubr.msk.f32.gmra.mrb[32].mxu1 %vm632_vm6, %v906_v26  ;;  %1510 = vmatprep.mubr.f32.mxu0 %v1823_v9 }
 0x500   :  { %1427 = vmatprep.mubr.f32.mxu1 %v1823_v9 }
 0x502   :  { %1720 = vmatmul.mubr.msk.f32.gmra.mrb[34].mxu0 %vm632_vm6, %v906_v26 }
 0x503   :  { %1715 = vmatmul.mubr.msk.f32.gmra.mrb[34].mxu1 %vm632_vm6, %v907_v37  ;;  %1516 = vmatprep.mubr.f32.mxu0 %v1823_v9 }
 0x504   :  { %1433 = vmatprep.mubr.f32.mxu1 %v1823_v9 }
 0x506   :  { %1721 = vmatmul.mubr.msk.f32.gmra.mrb[36].mxu0 %vm632_vm6, %v907_v37 }
 0x507   :  { %1716 = vmatmul.mubr.msk.f32.gmra.mrb[36].mxu1 %vm632_vm6, %v908_v40  ;;  %1522 = vmatprep.mubr.f32.mxu0 %v1823_v9 }
 0x50a   :  { %1722 = vmatmul.mubr.msk.f32.gmra.mrb[38].mxu0 %vm632_vm6, %v908_v40 }
 0x5ae   :  { %v1025_v28 = vpop.f32.mrb[14].mxu1  ;;  %v1114_v46 = vpop.f32.mrb[16].mxu0 }
 0x5af   :  { %v1027_v48 = vpop.f32.mrb[15].mxu1  ;;  %v1116_v50 = vpop.f32.mrb[17].mxu0  ;;  %v1226_v4 = vmul.f32 %v1025_v28, %v1999_v33  ;;  %v1228_v40 = vmul.f32 %v1114_v46, %v2021_v49 }
 0x5b0   :  { %v1227_v6 = vmul.f32 %v1027_v48, %v1995_v30 }
 0x5b2   :  { %v1031_v52 = vpop.f32.mrb[16].mxu1  ;;  %v1120_v22 = vpop.f32.mrb[18].mxu0 }
 0x5b3   :  { %v1033_v55 = vpop.f32.mrb[17].mxu1  ;;  %v1122_v56 = vpop.f32.mrb[19].mxu0  ;;  %v1232_v16 = vmul.f32 %v1031_v52, %v2008_v41 }
 0x5b4   :  { %v1233_v17 = vmul.f32 %v1033_v55, %v2011_v42 }
 0x5b6   :  { %v1037_v57 = vpop.f32.mrb[18].mxu1  ;;  %v1126_v19 = vpop.f32.mrb[20].mxu0 }
 0x5b7   :  { %v1039_v58 = vpop.f32.mrb[19].mxu1  ;;  %v1128_v62 = vpop.f32.mrb[21].mxu0  ;;  %v1238_v37 = vmul.f32 %v1037_v57, %v2032_v59  ;;  %v2315_v46 = vmul.f32 %v1126_v19, %v2054_v13 }
 0x5b8   :  { %v1239_v42 = vmul.f32 %v1039_v58, %v2035_v60  ;;  %v1235_v60 = vmul.f32 %v1122_v56, %v2082_v43 }
 0x5ba   :  { %v1043_v27 = vpop.f32.mrb[20].mxu1  ;;  %v1132_v63 = vpop.f32.mrb[22].mxu0 }
 0x5bb   :  { %v1045_v53 = vpop.f32.mrb[21].mxu1  ;;  %v1134_v0 = vpop.f32.mrb[23].mxu0  ;;  %v1244_v58 = vmul.f32 %v1043_v27, %v2042_v1 }
 0x5be   :  { %v2287_v3 = vpop.f32.mrb[22].mxu1 }
 0x5bf   :  { %v2289_v9 = vpop.f32.mrb[23].mxu1 }
 0x5c1   :  { %v1328_v20 = vpop.f32.mrb[24].mxu0 }
 0x5c2   :  { %v1529_v7 = vadd.f32 %v1328_v20, %v1226_v4  ;;  %v2293_v8 = vpop.f32.mrb[24].mxu1  ;;  %v1330_v11 = vpop.f32.mrb[25].mxu0  ;;  %v1229_v4 = vmul.f32 %v1116_v50, %v2069_v25  ;;  %v2319_v50 = vmul.f32 %v1128_v62, %v2111_v10 }
 0x5c3   :  { %v1530_v31 = vadd.f32 %v1330_v11, %v1227_v6  ;;  %v2295_v15 = vpop.f32.mrb[25].mxu1  ;;  %v1234_v6 = vmul.f32 %v1120_v22, %v2038_v61  ;;  %v2322_v22 = vmul.f32 %v1132_v63, %v2076_v34  ;;  %v2325_v11 = vmul.f32 %v1134_v0, %v2116_v12 }
 0x5c4   :  { %vm1553_vm12 = vcmp.ge.f32.partialorder %v1529_v7, 0.0  ;;  %v1577_v35 = vmul.f32 0.2, %v1529_v7  ;;  %v1231_v12 = vmul.f32 %v2289_v9, %v2088_v47 }
 0x5c5   :  { %vm1554_vm13 = vcmp.ge.f32.partialorder %v1530_v31, 0.0  ;;  %v1578_v18 = vmul.f32 0.2, %v1530_v31  ;;  %v1334_v14 = vpop.f32.mrb[26].mxu0 }
 0x5c6   :  { %v1601_v33 = vsel %vm1553_vm12, %v1529_v7, %v1577_v35  ;;  %v1535_v23 = vadd.f32 %v1334_v14, %v1232_v16  ;;  %v2299_v30 = vpop.f32.mrb[26].mxu1  ;;  %v1336_v24 = vpop.f32.mrb[27].mxu0  ;;  %v1245_v7 = vmul.f32 %v1045_v53, %v2045_v2 }
 0x5c7   :  { %1625 = vst [vmem:[#allocation3] sm:$0xff] %v1601_v33  ;;  %v1602_v26 = vsel %vm1554_vm13, %v1530_v31, %v1578_v18  ;;  %v1536_v32 = vadd.f32 %v1336_v24, %v1233_v17  ;;  %v2301_v36 = vpop.f32.mrb[27].mxu1  ;;  %v1230_v31 = vmul.f32 %v2287_v3, %v2085_v45  ;;  %v1236_v24 = vmul.f32 %v2293_v8, %v2102_v44 }
 0x5c8   :  { %1626 = vst [vmem:[#allocation3 + $0x8] sm:$0xff] %v1602_v26  ;;  %vm1559_vm14 = vcmp.ge.f32.partialorder %v1535_v23, 0.0  ;;  %v1583_v41 = vmul.f32 0.2, %v1535_v23  ;;  %v1242_v44 = vmul.f32 %v2299_v30, %v2123_v21 }
 0x5c9   :  { %vm1560_vm15 = vcmp.ge.f32.partialorder %v1536_v32, 0.0  ;;  %v1584_v38 = vmul.f32 0.2, %v1536_v32  ;;  %v1340_v39 = vpop.f32.mrb[28].mxu0 }
 0x5ca   :  { %v1607_v28 = vsel %vm1559_vm14, %v1535_v23, %v1583_v41  ;;  %v1541_v48 = vadd.f32 %v1340_v39, %v1238_v37  ;;  %v2306_v52 = vpop.f32.mrb[28].mxu1  ;;  %v1342_v55 = vpop.f32.mrb[29].mxu0 }
 0x5cb   :  { %1628 = vst [vmem:[#allocation3 + $0x18] sm:$0xff] %v1607_v28  ;;  %v1608_v59 = vsel %vm1560_vm15, %v1536_v32, %v1584_v38  ;;  %v1542_v57 = vadd.f32 %v1342_v55, %v1239_v42  ;;  %v2310_v20 = vpop.f32.mrb[29].mxu1  ;;  %v1237_v38 = vmul.f32 %v2295_v15, %v2107_v5  ;;  %v1248_v5 = vmul.f32 %v2306_v52, %v2137_v51 }
 0x5cc   :  { %1629 = vst [vmem:[#allocation3 + $0x20] sm:$0xff] %v1608_v59  ;;  %vm1565_vm0 = vcmp.ge.f32.partialorder %v1541_v48, 0.0  ;;  %v1589_v49 = vmul.f32 0.2, %v1541_v48 }
 0x5cd   :  { %vm1566_vm1 = vcmp.ge.f32.partialorder %v1542_v57, 0.0  ;;  %v1590_v25 = vmul.f32 0.2, %v1542_v57  ;;  %v1346_v61 = vpop.f32.mrb[30].mxu0 }
 0x5ce   :  { %v1613_v43 = vsel %vm1565_vm0, %v1541_v48, %v1589_v49  ;;  %v1547_v56 = vadd.f32 %v1346_v61, %v1244_v58  ;;  %v1348_v1 = vpop.f32.mrb[31].mxu0  ;;  %v1417_v27 = vpop.f32.mrb[30].mxu1 }
 0x5cf   :  { %1631 = vst [vmem:[#allocation3 + $0x30] sm:$0xff] %v1613_v43  ;;  %v1614_v13 = vsel %vm1566_vm1, %v1542_v57, %v1590_v25  ;;  %v1548_v19 = vadd.f32 %v1348_v1, %v1245_v7  ;;  %v1531_v2 = vadd.f32 %v1417_v27, %v1228_v40  ;;  %v1419_v53 = vpop.f32.mrb[31].mxu1 }
 0x5d0   :  { %1632 = vst [vmem:[#allocation3 + $0x38] sm:$0xff] %v1614_v13  ;;  %vm1571_vm2 = vcmp.ge.f32.partialorder %v1547_v56, 0.0  ;;  %v1595_v10 = vmul.f32 0.2, %v1547_v56  ;;  %v1532_v34 = vadd.f32 %v1419_v53, %v1229_v4 }
 0x5d1   :  { %vm1572_vm3 = vcmp.ge.f32.partialorder %v1548_v19, 0.0  ;;  %v1596_v62 = vmul.f32 0.2, %v1548_v19  ;;  %vm1555_vm4 = vcmp.ge.f32.partialorder %v1531_v2, 0.0  ;;  %v1579_v63 = vmul.f32 0.2, %v1531_v2 }
 0x5d2   :  { %v1619_v0 = vsel %vm1571_vm2, %v1547_v56, %v1595_v10  ;;  %vm1556_vm5 = vcmp.ge.f32.partialorder %v1532_v34, 0.0  ;;  %v1580_v16 = vmul.f32 0.2, %v1532_v34  ;;  %v1506_v35 = vpop.f32.mrb[32].mxu0  ;;  %v1423_v17 = vpop.f32.mrb[32].mxu1 }
 0x5d3   :  { %1634 = vst [vmem:[#allocation3 + $0x48] sm:$0xff] %v1619_v0  ;;  %v1620_v18 = vsel %vm1572_vm3, %v1548_v19, %v1596_v62  ;;  %v1603_v14 = vsel %vm1555_vm4, %v1531_v2, %v1579_v63  ;;  %v1533_v45 = vadd.f32 %v1506_v35, %v1230_v31  ;;  %v1537_v3 = vadd.f32 %v1423_v17, %v1234_v6  ;;  %v1508_v33 = vpop.f32.mrb[33].mxu0  ;;  %v1425_v23 = vpop.f32.mrb[33].mxu1 }
 0x5d4   :  { %1635 = vst [vmem:[#allocation3 + $0x50] sm:$0xff] %v1620_v18  ;;  %1627 = vst [vmem:[#allocation3 + $0x10] sm:$0xff] %v1603_v14  ;;  %v1604_v26 = vsel %vm1556_vm5, %v1532_v34, %v1580_v16  ;;  %v1534_v32 = vadd.f32 %v1508_v33, %v1231_v12  ;;  %v1538_v47 = vadd.f32 %v1425_v23, %v1235_v60 }
 0x5d5   :  { %1638 = vst [vmem:[#allocation3 + $0x60] sm:$0xff] %v1604_v26  ;;  %vm1557_vm6 = vcmp.ge.f32.partialorder %v1533_v45, 0.0  ;;  %v1581_v9 = vmul.f32 0.2, %v1533_v45  ;;  %vm1561_vm7 = vcmp.ge.f32.partialorder %v1537_v3, 0.0  ;;  %v1512_v40 = vpop.f32.mrb[34].mxu0  ;;  %v1243_v60 = vmul.f32 %v2301_v36, %v2127_v29 }
 0x5d6   :  { %v1585_v37 = vmul.f32 0.2, %v1537_v3  ;;  %vm1558_vm8 = vcmp.ge.f32.partialorder %v1534_v32, 0.0  ;;  %v1582_v41 = vmul.f32 0.2, %v1534_v32  ;;  %vm1562_vm9 = vcmp.ge.f32.partialorder %v1538_v47, 0.0 }
 0x5d7   :  { %v1586_v42 = vmul.f32 0.2, %v1538_v47  ;;  %v1605_v8 = vsel %vm1557_vm6, %v1533_v45, %v1581_v9  ;;  %v1429_v28 = vpop.f32.mrb[34].mxu1  ;;  %v1539_v4 = vadd.f32 %v1512_v40, %v1236_v24  ;;  %v1514_v59 = vpop.f32.mrb[35].mxu0  ;;  %v1249_v29 = vmul.f32 %v2310_v20, %v2141_v54 }
 0x5d8   :  { %v1609_v39 = vsel %vm1561_vm7, %v1537_v3, %v1585_v37  ;;  %1639 = vst [vmem:[#allocation3 + $0x68] sm:$0xff] %v1605_v8  ;;  %v1606_v48 = vsel %vm1558_vm8, %v1534_v32, %v1582_v41  ;;  %v1543_v6 = vadd.f32 %v1429_v28, %v2315_v46  ;;  %v1431_v57 = vpop.f32.mrb[35].mxu1  ;;  %v1540_v21 = vadd.f32 %v1514_v59, %v1237_v38 }
 0x5d9   :  { %1630 = vst [vmem:[#allocation3 + $0x28] sm:$0xff] %v1609_v39  ;;  %v1610_v55 = vsel %vm1562_vm9, %v1538_v47, %v1586_v42  ;;  %1640 = vst [vmem:[#allocation3 + $0x70] sm:$0xff] %v1606_v48  ;;  %v1544_v15 = vadd.f32 %v1431_v57, %v2319_v50  ;;  %v1518_v30 = vpop.f32.mrb[36].mxu0  ;;  %vm1563_vm10 = vcmp.ge.f32.partialorder %v1539_v4, 0.0  ;;  %v1587_v58 = vmul.f32 0.2, %v1539_v4 }
 0x5da   :  { %1641 = vst [vmem:[#allocation3 + $0x78] sm:$0xff] %v1610_v55  ;;  %vm1567_vm11 = vcmp.ge.f32.partialorder %v1543_v6, 0.0  ;;  %v1591_v49 = vmul.f32 0.2, %v1543_v6  ;;  %vm1564_vm12 = vcmp.ge.f32.partialorder %v1540_v21, 0.0  ;;  %v1545_v51 = vadd.f32 %v1518_v30, %v1242_v44  ;;  %v1435_v52 = vpop.f32.mrb[36].mxu1 }
 0x5db   :  { %v1588_v46 = vmul.f32 0.2, %v1540_v21  ;;  %vm1568_vm13 = vcmp.ge.f32.partialorder %v1544_v15, 0.0  ;;  %v1592_v7 = vmul.f32 0.2, %v1544_v15  ;;  %v1611_v36 = vsel %vm1563_vm10, %v1539_v4, %v1587_v58  ;;  %v1520_v61 = vpop.f32.mrb[37].mxu0 }
 0x5dc   :  { %v1615_v25 = vsel %vm1567_vm11, %v1543_v6, %v1591_v49  ;;  %1642 = vst [vmem:[#allocation3 + $0x80] sm:$0xff] %v1611_v36  ;;  %v1549_v56 = vadd.f32 %v1435_v52, %v2322_v22  ;;  %v1546_v1 = vadd.f32 %v1520_v61, %v1243_v60  ;;  %v1437_v27 = vpop.f32.mrb[37].mxu1  ;;  %vm1569_vm14 = vcmp.ge.f32.partialorder %v1545_v51, 0.0 }
 0x5dd   :  { %1633 = vst [vmem:[#allocation3 + $0x40] sm:$0xff] %v1615_v25  ;;  %v1612_v50 = vsel %vm1564_vm12, %v1540_v21, %v1588_v46  ;;  %v1616_v43 = vsel %vm1568_vm13, %v1544_v15, %v1592_v7  ;;  %v1524_v13 = vpop.f32.mrb[38].mxu0  ;;  %v1593_v19 = vmul.f32 0.2, %v1545_v51  ;;  %v1550_v54 = vadd.f32 %v1437_v27, %v2325_v11 }
 0x5de   :  { %1643 = vst [vmem:[#allocation3 + $0x88] sm:$0xff] %v1612_v50  ;;  %1644 = vst [vmem:[#allocation3 + $0x90] sm:$0xff] %v1616_v43  ;;  %v1551_v20 = vadd.f32 %v1524_v13, %v1248_v5  ;;  %v1526_v2 = vpop.f32.mrb[39].mxu0  ;;  %vm1573_vm15 = vcmp.ge.f32.partialorder %v1549_v56, 0.0  ;;  %v1597_v53 = vmul.f32 0.2, %v1549_v56 }
 0x5df   :  { %vm1570_vm0 = vcmp.ge.f32.partialorder %v1546_v1, 0.0  ;;  %v1594_v31 = vmul.f32 0.2, %v1546_v1  ;;  %v1617_v10 = vsel %vm1569_vm14, %v1545_v51, %v1593_v19  ;;  %vm1574_vm1 = vcmp.ge.f32.partialorder %v1550_v54, 0.0 }
 0x5e0   :  { %v1598_v34 = vmul.f32 0.2, %v1550_v54  ;;  %vm1575_vm2 = vcmp.ge.f32.partialorder %v1551_v20, 0.0  ;;  %1645 = vst [vmem:[#allocation3 + $0x98] sm:$0xff] %v1617_v10  ;;  %v1621_v22 = vsel %vm1573_vm15, %v1549_v56, %v1597_v53  ;;  %v1599_v63 = vmul.f32 0.2, %v1551_v20 }
 0x5e1   :  { %v1618_v62 = vsel %vm1570_vm0, %v1546_v1, %v1594_v31  ;;  %v1552_v12 = vadd.f32 %v1526_v2, %v1249_v29  ;;  %1636 = vst [vmem:[#allocation3 + $0x58] sm:$0xff] %v1621_v22 }
 0x5e2   :  { %1646 = vst [vmem:[#allocation3 + $0xa0] sm:$0xff] %v1618_v62  ;;  %v1622_v11 = vsel %vm1574_vm1, %v1550_v54, %v1598_v34  ;;  %v1623_v0 = vsel %vm1575_vm2, %v1551_v20, %v1599_v63 }
 0x5e3   :  { %1647 = vst [vmem:[#allocation3 + $0xa8] sm:$0xff] %v1622_v11  ;;  %vm1576_vm3 = vcmp.ge.f32.partialorder %v1552_v12, 0.0  ;;  %v1600_v16 = vmul.f32 0.2, %v1552_v12  ;;  %1648 = vst [vmem:[#allocation3 + $0xb0] sm:$0xff] %v1623_v0 }
 0x5e5   :  { %v1624_v35 = vsel %vm1576_vm3, %v1552_v12, %v1600_v16 }
 0x5e6   :  { %1649 = vst [vmem:[#allocation3 + $0xb8] sm:$0xff] %v1624_v35 }
 0x5e7   :  { %1807 = shalt.err (!%p1804_p4)
}
 0x5e8   :  { %s1808_s0 = scalar_lea.hbm %s2368_s9, 3072 }
 0x5e9   :  { %p1809_p5 = scmp.ne.s32.totalorder %s2368_s9, %s1808_s0  ;;  %p1812_p6 = scmp.lt.u32.totalorder %s1808_s0, %s2368_s9 }
 0x5eb   :  { %p1814_p7 = pnand %p1812_p6, %p1809_p5 }
 0x5ed   :  { %1817 = shalt.err (!%p1814_p7)
}
 0x5ee   :  { %s1831_s24 = smov 384   ;;  %s1832_s6 = smov 24  }
 0x5ef   :  { %1661 = dma.vmem_to_hbm [thread:$0]  %s1656_s16, 3072, %s2368_s9, [#allocation4], %s1831_s24, %s1831_s24, %s1832_s6  }
 0x5f0   :  { %1818 = dma.done.wait [#allocation4], 3072  }
 0x5f1   :  { %1819 = vsyncadd [#allocation4], 4294964224 }
 0x5f2   :  { %1665 = vsyncpa [#allocation4], 1 }

</bundles_post_ra>
